<compile_context>
chip_gen: v7x
topology: tpu7x:2x2x1
jax: 0.10.0
libtpu: 0.0.40
codegen_flags: <defaults>
</compile_context>

<pallas_src>
import functools

import jax
import jax.numpy as jnp
from jax.experimental import pallas as pl
from jax.experimental.pallas import tpu as pltpu

_VMEM_LIMIT_BYTES = 32 * 1024 * 1024  # explicit scoped-VMEM budget; safe on v5e/v6e/v7x


def _round_up(x, k):
    return -(-x // k) * k


def _stats_kernel(x_ref, w1_ref, b1_ref, w2_ref, stat_ref, *,
                  valid_m, tile_m, slope, padded):
    """conv1 -> LeakyReLU -> conv2, then per-tile partial BN sums.

    Channel-major layout (pixels on the 128-lane axis):
      x_ref    : (c_in, tile_m)
      w1_ref   : (ndf, c_in)      b1_ref : (ndf, 1)
      w2_ref   : (2*ndf, ndf)
      stat_ref : (2*ndf, 128)     lane 0 = sum, lane 1 = sum of squares
    """
    x = x_ref[...]
    h1 = jnp.dot(w1_ref[...], x, preferred_element_type=jnp.float32) + b1_ref[...]
    h1 = jnp.where(h1 > 0, h1, slope * h1)                      # LeakyReLU(0.2)
    h2 = jnp.dot(w2_ref[...], h1, preferred_element_type=jnp.float32)

    if padded:  # mask pixels beyond the true M so BN stats stay unbiased
        col = (pl.program_id(0) * tile_m
               + jax.lax.broadcasted_iota(jnp.int32, (1, tile_m), 1))
        h2 = jnp.where(col < valid_m, h2, 0.0)

    s = jnp.sum(h2, axis=1, keepdims=True)          # (2*ndf, 1)
    sq = jnp.sum(h2 * h2, axis=1, keepdims=True)    # (2*ndf, 1)
    lane = jax.lax.broadcasted_iota(jnp.int32, stat_ref.shape, 1)
    stat_ref[...] = jnp.where(lane == 0, s, jnp.where(lane == 1, sq, 0.0))


def _output_kernel(x_ref, w1_ref, b1_ref, w2_ref, scale_ref, shift_ref, w3_ref,
                   out_ref, *, slope):
    """Recompute conv2 activations, apply folded BN affine, LeakyReLU, conv3."""
    x = x_ref[...]
    h1 = jnp.dot(w1_ref[...], x, preferred_element_type=jnp.float32) + b1_ref[...]
    h1 = jnp.where(h1 > 0, h1, slope * h1)
    h2 = jnp.dot(w2_ref[...], h1, preferred_element_type=jnp.float32)
    hn = h2 * scale_ref[...] + shift_ref[...]        # BatchNorm folded to scale/shift
    hn = jnp.where(hn > 0, hn, slope * hn)
    # conv3 (1 output channel, bias=False): sublane reduce instead of a degenerate
    # M=1 MXU matmul; the output block stays lane-dense (1, tile_m).
    y = jnp.sum(hn * w3_ref[...], axis=0, keepdims=True)
    out_ref[...] = y.astype(out_ref.dtype)


def pixel_discriminator(x_nchw, params, *, tile_m=4096, eps=1e-5, slope=0.2):
    w1, b1, w2, gamma, beta, w3 = params
    n, c_in, hgt, wid = x_nchw.shape
    ndf = w1.shape[0]
    c2 = w2.shape[0]
    m = n * hgt * wid

    tile_m = min(tile_m, _round_up(m, 128))
    m_pad = _round_up(m, tile_m)
    num_tiles = m_pad // tile_m
    padded = m_pad != m

    # Channel-major pixel layout: (C, M) with pixels on the lane axis.
    x_cm = jnp.transpose(x_nchw, (1, 0, 2, 3)).reshape(c_in, m).astype(jnp.float32)
    if padded:
        x_cm = jnp.pad(x_cm, ((0, 0), (0, m_pad - m)))

    def weight_spec(shape):
        return pl.BlockSpec(shape, lambda t: (0, 0))

    x_spec = pl.BlockSpec((c_in, tile_m), lambda t: (0, t))
    cparams = pltpu.CompilerParams(dimension_semantics=("parallel",),
                                   vmem_limit_bytes=_VMEM_LIMIT_BYTES)

    # ---- pass 1: per-tile partial BN statistics (parallel over tiles) -----------
    stats = pl.pallas_call(
        functools.partial(_stats_kernel, valid_m=m, tile_m=tile_m,
                          slope=slope, padded=padded),
        out_shape=jax.ShapeDtypeStruct((c2, num_tiles * 128), jnp.float32),
        grid=(num_tiles,),
        in_specs=[x_spec,
                  weight_spec((ndf, c_in)),
                  weight_spec((ndf, 1)),
                  weight_spec((c2, ndf))],
        out_specs=pl.BlockSpec((c2, 128), lambda t: (0, t)),
        compiler_params=cparams,
    )(x_cm, w1, b1, w2)

    # ---- tiny finalize: fold batch stats + gamma/beta into scale/shift ----------
    stats = stats.reshape(c2, num_tiles, 128)
    tot_sum = jnp.sum(stats[:, :, 0], axis=1)             # (c2,)
    tot_sumsq = jnp.sum(stats[:, :, 1], axis=1)
    mean = tot_sum / m
    var = jnp.maximum(tot_sumsq / m - mean * mean, 0.0)   # biased var (training BN)
    inv_std = jax.lax.rsqrt(var + eps)
    g = gamma[:, 0] * inv_std
    scale = g[:, None]                                    # (c2, 1)
    shift = (beta[:, 0] - mean * g)[:, None]              # (c2, 1)

    # ---- pass 2: normalize + LeakyReLU + conv3 (parallel over tiles) ------------
    # TODO(synk): for small/medium M on v5e/v6e a single-call variant could cache h2
    # in persistent VMEM during the stats pass and skip this recompute (budget
    # <~24 MiB on v7x); the recompute form keeps both passes fully tile-parallel.
    y = pl.pallas_call(
        functools.partial(_output_kernel, slope=slope),
        out_shape=jax.ShapeDtypeStruct((1, m_pad), jnp.float32),
        grid=(num_tiles,),
        in_specs=[x_spec,
                  weight_spec((ndf, c_in)),
                  weight_spec((ndf, 1)),
                  weight_spec((c2, ndf)),
                  weight_spec((c2, 1)),
                  weight_spec((c2, 1)),
                  weight_spec((c2, 1))],
        out_specs=pl.BlockSpec((1, tile_m), lambda t: (0, t)),
        compiler_params=cparams,
    )(x_cm, w1, b1, w2, scale, shift, w3)

    return y[0, :m].reshape(n, hgt, wid)[:, None, :, :]   # back to NCHW (N, 1, H, W)


def reference(x_nchw, params, *, eps=1e-5, slope=0.2):
    """Pure-JAX reference with the module's semantics (training-mode BatchNorm)."""
    w1, b1, w2, gamma, beta, w3 = params
    n, c_in, hgt, wid = x_nchw.shape
    xm = jnp.transpose(x_nchw, (1, 0, 2, 3)).reshape(c_in, -1)      # (C, M)
    hp = jax.lax.Precision.HIGHEST
    h1 = jnp.dot(w1, xm, precision=hp) + b1
    h1 = jnp.where(h1 > 0, h1, slope * h1)
    h2 = jnp.dot(w2, h1, precision=hp)
    mean = jnp.mean(h2, axis=1, keepdims=True)
    var = jnp.mean(h2 * h2, axis=1, keepdims=True) - mean * mean
    hn = (h2 - mean) * jax.lax.rsqrt(var + eps) * gamma + beta
    hn = jnp.where(hn > 0, hn, slope * hn)
    y = jnp.sum(hn * w3, axis=0, keepdims=True)                     # (1, M)
    return y.reshape(1, n, hgt, wid).transpose(1, 0, 2, 3)


def make_params(key, input_nc, ndf):
    k1, k2, k3, k4 = jax.random.split(key, 4)
    # Conv 1x1 weights stored channel-major: (out_c, in_c); conv3 as a column.
    w1 = 0.3 * jax.random.normal(k1, (ndf, input_nc), jnp.float32)
    b1 = 0.1 * jax.random.normal(k2, (ndf, 1), jnp.float32)
    w2 = 0.1 * jax.random.normal(k3, (2 * ndf, ndf), jnp.float32)
    gamma = jnp.ones((2 * ndf, 1), jnp.float32)    # BatchNorm2d default init
    beta = jnp.zeros((2 * ndf, 1), jnp.float32)
    w3 = 0.1 * jax.random.normal(k4, (2 * ndf, 1), jnp.float32)
    return (w1, b1, w2, gamma, beta, w3)


if __name__ == "__main__":
    N, C_IN, H, W = 2, 4, 16, 16
    NDF = 64

    key = jax.random.PRNGKey(0)
    kx, kp = jax.random.split(key)
    x = jax.random.normal(kx, (N, C_IN, H, W), jnp.float32)
    params = make_params(kp, C_IN, NDF)

    fwd = jax.jit(pixel_discriminator)
    out = jax.block_until_ready(fwd(x, params))

    ref = reference(x, params)
    assert out.shape == (N, 1, H, W), out.shape
    max_err = float(jnp.max(jnp.abs(out - ref)))
    assert jnp.allclose(out, ref, rtol=2e-3, atol=2e-3), max_err

    print("KERNEL_OK")
</pallas_src>

<mosaic_0001>
module attributes {stable_mosaic.version = 11 : i64} {
  func.func @_stats_kernel(%arg0: i32, %arg1: memref<4x512xf32, #tpu.memory_space<vmem>>, %arg2: memref<64x4xf32, #tpu.memory_space<vmem>>, %arg3: memref<64x1xf32, #tpu.memory_space<vmem>>, %arg4: memref<128x64xf32, #tpu.memory_space<vmem>>, %arg5: memref<128x128xf32, #tpu.memory_space<vmem>>) attributes {dimension_semantics = [#tpu.dimension_semantics<parallel>], iteration_bounds = array<i64: 1>, scalar_prefetch = 0 : i64, scratch_operands = 0 : i64, tpu.core_type = #tpu.core_type<tc>, window_params = [{transform_indices = @transform_0, window_bounds = array<i64: 4, 512>}, {pipeline_mode = #tpu.pipeline_mode<synchronous>, transform_indices = @transform_1, window_bounds = array<i64: 64, 4>}, {pipeline_mode = #tpu.pipeline_mode<synchronous>, transform_indices = @transform_2, window_bounds = array<i64: 64, 1>}, {pipeline_mode = #tpu.pipeline_mode<synchronous>, transform_indices = @transform_3, window_bounds = array<i64: 128, 64>}, {transform_indices = @transform_4, window_bounds = array<i64: 128, 128>}]} {
    %c0 = arith.constant 0 : index
    %c0_0 = arith.constant 0 : index
    %0 = vector.load %arg1[%c0, %c0_0] : memref<4x512xf32, #tpu.memory_space<vmem>>, vector<4x512xf32>
    %c0_1 = arith.constant 0 : index
    %c0_2 = arith.constant 0 : index
    %1 = vector.load %arg2[%c0_1, %c0_2] : memref<64x4xf32, #tpu.memory_space<vmem>>, vector<64x4xf32>
    %cst = arith.constant dense<0.000000e+00> : vector<64x512xf32>
    %2 = tpu.matmul %1, %0, %cst {dimension_numbers = #tpu.dot_dimension_numbers<[1], [0], [0], [1], [0, 0, 1, 1], [], []>} : vector<64x4xf32>, vector<4x512xf32>, vector<64x512xf32> -> vector<64x512xf32>
    %c0_3 = arith.constant 0 : index
    %c0_4 = arith.constant 0 : index
    %3 = vector.load %arg3[%c0_3, %c0_4] : memref<64x1xf32, #tpu.memory_space<vmem>>, vector<64x1xf32>
    %4 = vector.broadcast %3 : vector<64x1xf32> to vector<64x512xf32>
    %5 = arith.addf %2, %4 : vector<64x512xf32>
    %cst_5 = arith.constant 0.000000e+00 : f32
    %6 = vector.broadcast %cst_5 : f32 to vector<64x512xf32>
    %7 = arith.cmpf ogt, %5, %6 : vector<64x512xf32>
    %cst_6 = arith.constant 2.000000e-01 : f32
    %8 = vector.broadcast %cst_6 : f32 to vector<64x512xf32>
    %9 = arith.mulf %8, %5 : vector<64x512xf32>
    %10 = arith.select %7, %5, %9 : vector<64x512xi1>, vector<64x512xf32>
    %c0_7 = arith.constant 0 : index
    %c0_8 = arith.constant 0 : index
    %11 = vector.load %arg4[%c0_7, %c0_8] : memref<128x64xf32, #tpu.memory_space<vmem>>, vector<128x64xf32>
    %cst_9 = arith.constant dense<0.000000e+00> : vector<128x512xf32>
    %12 = tpu.matmul %11, %10, %cst_9 {dimension_numbers = #tpu.dot_dimension_numbers<[1], [0], [0], [1], [0, 0, 1, 1], [], []>} : vector<128x64xf32>, vector<64x512xf32>, vector<128x512xf32> -> vector<128x512xf32>
    %cst_10 = arith.constant dense<0.000000e+00> : vector<128xf32>
    %13 = vector.multi_reduction <add>, %12, %cst_10 [1] : vector<128x512xf32> to vector<128xf32>
    %14 = vector.shape_cast %13 : vector<128xf32> to vector<128x1xf32>
    %15 = arith.mulf %12, %12 : vector<128x512xf32>
    %cst_11 = arith.constant dense<0.000000e+00> : vector<128xf32>
    %16 = vector.multi_reduction <add>, %15, %cst_11 [1] : vector<128x512xf32> to vector<128xf32>
    %17 = vector.shape_cast %16 : vector<128xf32> to vector<128x1xf32>
    %18 = tpu.iota {dimensions = array<i32: 1>} : vector<128x128xi32>
    %c0_i32 = arith.constant 0 : i32
    %19 = vector.broadcast %c0_i32 : i32 to vector<128x128xi32>
    %20 = arith.cmpi eq, %18, %19 : vector<128x128xi32>
    %c1_i32 = arith.constant 1 : i32
    %21 = vector.broadcast %c1_i32 : i32 to vector<128x128xi32>
    %22 = arith.cmpi eq, %18, %21 : vector<128x128xi32>
    %cst_12 = arith.constant 0.000000e+00 : f32
    %23 = vector.shape_cast %17 : vector<128x1xf32> to vector<128x1xf32>
    %24 = vector.broadcast %23 : vector<128x1xf32> to vector<128x128xf32>
    %25 = vector.broadcast %cst_12 : f32 to vector<128x128xf32>
    %26 = arith.select %22, %24, %25 : vector<128x128xi1>, vector<128x128xf32>
    %27 = vector.shape_cast %14 : vector<128x1xf32> to vector<128x1xf32>
    %28 = vector.broadcast %27 : vector<128x1xf32> to vector<128x128xf32>
    %29 = arith.select %20, %28, %26 : vector<128x128xi1>, vector<128x128xf32>
    %c0_13 = arith.constant 0 : index
    %c0_14 = arith.constant 0 : index
    %30 = vector.load %arg5[%c0_13, %c0_14] : memref<128x128xf32, #tpu.memory_space<vmem>>, vector<128x128xf32>
    tpu.vector_store %arg5[%c0_13, %c0_14], %29 {strides = array<i32>} : memref<128x128xf32, #tpu.memory_space<vmem>>, vector<128x128xf32>,
    return
  }
  func.func @transform_0(%arg0: i32) -> (i32, i32) {
    %c0_i32 = arith.constant 0 : i32
    %c0_i32_0 = arith.constant 0 : i32
    return %c0_i32, %arg0 : i32, i32
  }
  func.func @transform_1(%arg0: i32) -> (i32, i32) {
    %c0_i32 = arith.constant 0 : i32
    %c0_i32_0 = arith.constant 0 : i32
    %c0_i32_1 = arith.constant 0 : i32
    return %c0_i32, %c0_i32_0 : i32, i32
  }
  func.func @transform_2(%arg0: i32) -> (i32, i32) {
    %c0_i32 = arith.constant 0 : i32
    %c0_i32_0 = arith.constant 0 : i32
    %c0_i32_1 = arith.constant 0 : i32
    return %c0_i32, %c0_i32_0 : i32, i32
  }
  func.func @transform_3(%arg0: i32) -> (i32, i32) {
    %c0_i32 = arith.constant 0 : i32
    %c0_i32_0 = arith.constant 0 : i32
    %c0_i32_1 = arith.constant 0 : i32
    return %c0_i32, %c0_i32_0 : i32, i32
  }
  func.func @transform_4(%arg0: i32) -> (i32, i32) {
    %c0_i32 = arith.constant 0 : i32
    %c0_i32_0 = arith.constant 0 : i32
    return %c0_i32, %arg0 : i32, i32
  }
}

module attributes {stable_mosaic.version = 11 : i64} {
  func.func @_output_kernel(%arg0: i32, %arg1: memref<4x512xf32, #tpu.memory_space<vmem>>, %arg2: memref<64x4xf32, #tpu.memory_space<vmem>>, %arg3: memref<64x1xf32, #tpu.memory_space<vmem>>, %arg4: memref<128x64xf32, #tpu.memory_space<vmem>>, %arg5: memref<128x1xf32, #tpu.memory_space<vmem>>, %arg6: memref<128x1xf32, #tpu.memory_space<vmem>>, %arg7: memref<128x1xf32, #tpu.memory_space<vmem>>, %arg8: memref<1x512xf32, #tpu.memory_space<vmem>>) attributes {dimension_semantics = [#tpu.dimension_semantics<parallel>], iteration_bounds = array<i64: 1>, scalar_prefetch = 0 : i64, scratch_operands = 0 : i64, tpu.core_type = #tpu.core_type<tc>, window_params = [{transform_indices = @transform_0, window_bounds = array<i64: 4, 512>}, {pipeline_mode = #tpu.pipeline_mode<synchronous>, transform_indices = @transform_1, window_bounds = array<i64: 64, 4>}, {pipeline_mode = #tpu.pipeline_mode<synchronous>, transform_indices = @transform_2, window_bounds = array<i64: 64, 1>}, {pipeline_mode = #tpu.pipeline_mode<synchronous>, transform_indices = @transform_3, window_bounds = array<i64: 128, 64>}, {pipeline_mode = #tpu.pipeline_mode<synchronous>, transform_indices = @transform_4, window_bounds = array<i64: 128, 1>}, {pipeline_mode = #tpu.pipeline_mode<synchronous>, transform_indices = @transform_5, window_bounds = array<i64: 128, 1>}, {pipeline_mode = #tpu.pipeline_mode<synchronous>, transform_indices = @transform_6, window_bounds = array<i64: 128, 1>}, {transform_indices = @transform_7, window_bounds = array<i64: 1, 512>}]} {
    %c0 = arith.constant 0 : index
    %c0_0 = arith.constant 0 : index
    %0 = vector.load %arg1[%c0, %c0_0] : memref<4x512xf32, #tpu.memory_space<vmem>>, vector<4x512xf32>
    %c0_1 = arith.constant 0 : index
    %c0_2 = arith.constant 0 : index
    %1 = vector.load %arg2[%c0_1, %c0_2] : memref<64x4xf32, #tpu.memory_space<vmem>>, vector<64x4xf32>
    %cst = arith.constant dense<0.000000e+00> : vector<64x512xf32>
    %2 = tpu.matmul %1, %0, %cst {dimension_numbers = #tpu.dot_dimension_numbers<[1], [0], [0], [1], [0, 0, 1, 1], [], []>} : vector<64x4xf32>, vector<4x512xf32>, vector<64x512xf32> -> vector<64x512xf32>
    %c0_3 = arith.constant 0 : index
    %c0_4 = arith.constant 0 : index
    %3 = vector.load %arg3[%c0_3, %c0_4] : memref<64x1xf32, #tpu.memory_space<vmem>>, vector<64x1xf32>
    %4 = vector.broadcast %3 : vector<64x1xf32> to vector<64x512xf32>
    %5 = arith.addf %2, %4 : vector<64x512xf32>
    %cst_5 = arith.constant 0.000000e+00 : f32
    %6 = vector.broadcast %cst_5 : f32 to vector<64x512xf32>
    %7 = arith.cmpf ogt, %5, %6 : vector<64x512xf32>
    %cst_6 = arith.constant 2.000000e-01 : f32
    %8 = vector.broadcast %cst_6 : f32 to vector<64x512xf32>
    %9 = arith.mulf %8, %5 : vector<64x512xf32>
    %10 = arith.select %7, %5, %9 : vector<64x512xi1>, vector<64x512xf32>
    %c0_7 = arith.constant 0 : index
    %c0_8 = arith.constant 0 : index
    %11 = vector.load %arg4[%c0_7, %c0_8] : memref<128x64xf32, #tpu.memory_space<vmem>>, vector<128x64xf32>
    %cst_9 = arith.constant dense<0.000000e+00> : vector<128x512xf32>
    %12 = tpu.matmul %11, %10, %cst_9 {dimension_numbers = #tpu.dot_dimension_numbers<[1], [0], [0], [1], [0, 0, 1, 1], [], []>} : vector<128x64xf32>, vector<64x512xf32>, vector<128x512xf32> -> vector<128x512xf32>
    %c0_10 = arith.constant 0 : index
    %c0_11 = arith.constant 0 : index
    %13 = vector.load %arg5[%c0_10, %c0_11] : memref<128x1xf32, #tpu.memory_space<vmem>>, vector<128x1xf32>
    %14 = vector.broadcast %13 : vector<128x1xf32> to vector<128x512xf32>
    %15 = arith.mulf %12, %14 : vector<128x512xf32>
    %c0_12 = arith.constant 0 : index
    %c0_13 = arith.constant 0 : index
    %16 = vector.load %arg6[%c0_12, %c0_13] : memref<128x1xf32, #tpu.memory_space<vmem>>, vector<128x1xf32>
    %17 = vector.broadcast %16 : vector<128x1xf32> to vector<128x512xf32>
    %18 = arith.addf %15, %17 : vector<128x512xf32>
    %cst_14 = arith.constant 0.000000e+00 : f32
    %19 = vector.broadcast %cst_14 : f32 to vector<128x512xf32>
    %20 = arith.cmpf ogt, %18, %19 : vector<128x512xf32>
    %cst_15 = arith.constant 2.000000e-01 : f32
    %21 = vector.broadcast %cst_15 : f32 to vector<128x512xf32>
    %22 = arith.mulf %21, %18 : vector<128x512xf32>
    %23 = arith.select %20, %18, %22 : vector<128x512xi1>, vector<128x512xf32>
    %c0_16 = arith.constant 0 : index
    %c0_17 = arith.constant 0 : index
    %24 = vector.load %arg7[%c0_16, %c0_17] : memref<128x1xf32, #tpu.memory_space<vmem>>, vector<128x1xf32>
    %25 = vector.broadcast %24 : vector<128x1xf32> to vector<128x512xf32>
    %26 = arith.mulf %23, %25 : vector<128x512xf32>
    %cst_18 = arith.constant dense<0.000000e+00> : vector<512xf32>
    %27 = vector.multi_reduction <add>, %26, %cst_18 [0] : vector<128x512xf32> to vector<512xf32>
    %28 = vector.shape_cast %27 : vector<512xf32> to vector<1x512xf32>
    %c0_19 = arith.constant 0 : index
    %c0_20 = arith.constant 0 : index
    %29 = vector.load %arg8[%c0_19, %c0_20] : memref<1x512xf32, #tpu.memory_space<vmem>>, vector<1x512xf32>
    tpu.vector_store %arg8[%c0_19, %c0_20], %28 {strides = array<i32>} : memref<1x512xf32, #tpu.memory_space<vmem>>, vector<1x512xf32>,
    return
  }
  func.func @transform_0(%arg0: i32) -> (i32, i32) {
    %c0_i32 = arith.constant 0 : i32
    %c0_i32_0 = arith.constant 0 : i32
    return %c0_i32, %arg0 : i32, i32
  }
  func.func @transform_1(%arg0: i32) -> (i32, i32) {
    %c0_i32 = arith.constant 0 : i32
    %c0_i32_0 = arith.constant 0 : i32
    %c0_i32_1 = arith.constant 0 : i32
    return %c0_i32, %c0_i32_0 : i32, i32
  }
  func.func @transform_2(%arg0: i32) -> (i32, i32) {
    %c0_i32 = arith.constant 0 : i32
    %c0_i32_0 = arith.constant 0 : i32
    %c0_i32_1 = arith.constant 0 : i32
    return %c0_i32, %c0_i32_0 : i32, i32
  }
  func.func @transform_3(%arg0: i32) -> (i32, i32) {
    %c0_i32 = arith.constant 0 : i32
    %c0_i32_0 = arith.constant 0 : i32
    %c0_i32_1 = arith.constant 0 : i32
    return %c0_i32, %c0_i32_0 : i32, i32
  }
  func.func @transform_4(%arg0: i32) -> (i32, i32) {
    %c0_i32 = arith.constant 0 : i32
    %c0_i32_0 = arith.constant 0 : i32
    %c0_i32_1 = arith.constant 0 : i32
    return %c0_i32, %c0_i32_0 : i32, i32
  }
  func.func @transform_5(%arg0: i32) -> (i32, i32) {
    %c0_i32 = arith.constant 0 : i32
    %c0_i32_0 = arith.constant 0 : i32
    %c0_i32_1 = arith.constant 0 : i32
    return %c0_i32, %c0_i32_0 : i32, i32
  }
  func.func @transform_6(%arg0: i32) -> (i32, i32) {
    %c0_i32 = arith.constant 0 : i32
    %c0_i32_0 = arith.constant 0 : i32
    %c0_i32_1 = arith.constant 0 : i32
    return %c0_i32, %c0_i32_0 : i32, i32
  }
  func.func @transform_7(%arg0: i32) -> (i32, i32) {
    %c0_i32 = arith.constant 0 : i32
    %c0_i32_0 = arith.constant 0 : i32
    return %c0_i32, %arg0 : i32, i32
  }
}

</mosaic_0001>

<bundles_post_ra>
// kernel: squeeze.9
= control target key start
LH: loop header
LB: loop body
LE: loop exit
PB: predicated region body
PF: predicated region fallthrough
CT: control target
= control target key end

     0   :  { %s135_s0 = inlined_call_operand.vmem [shape: f32[512], index: 0, kind: input, shape index: {}]   ;;  %s136_s1 = inlined_call_operand.hbm [shape: f32[2,1,16,16], index: 1, kind: output, shape index: {}]  }
   0x1   :  { %v5_v0 = vld [vmem:[%s135_s0] sm:$0xf] }
   0x2   :  { %6 = vst [vmem:[#allocation2] sm:$0xf] %v5_v0 }
   0x3   :  { %2 = vsyncpa [#allocation1], 0  ;;  %s94_s0 = smov 112   ;;  %s95_s8 = smov 80   ;;  %vm8_vm0 = vcmask 130048  }
   0x4   :  { %s96_s9 = smov 96   ;;  %s97_s10 = smov 64  }
   0x5   :  { %s98_s11 = smov 48   ;;  %s99_s12 = smov 32  }
   0x6   :  { %s100_s13 = smov 16   ;;  %s101_s14 = smov [#allocation0]  }
   0x7   :  { %s56_s15 = sshll.u32 %s101_s14, 4  ;;  %s57_s15 = int_to_ptr.vmem [resolvable:$true] %s56_s15 }
   0x8   :  { %s70_s16 = scalar_lea.vmem %s57_s15, 512  ;;  %p75_p1 = scmp.lt.s32.totalorder %s57_s15, %s57_s15 }
   0x9   :  { %v10_v1 = vld [vmem:[#allocation2] sm:$0xf]   ;;  %p71_p0 = scmp.ne.s32.totalorder %s57_s15, %s70_s16  ;;  %p76_p2 = scmp.lt.s32.totalorder %s70_s16, %s70_s16 }
   0xa   :  { %v22_v2 = vld [vmem:[#allocation2] sm:$0xf]   ;;  %11 = vrot.lane.b32.xlu0 %v10_v1, %s94_s0 }
   0xb   :  { %23 = vrot.lane.b32.xlu1 %v22_v2, %s95_s8  ;;  %v16_v3 = vld [vmem:[#allocation2] sm:$0xf]   ;;  %p77_p3 = por %p76_p2, %p75_p1 }
   0xc   :  { %v28_v4 = vld [vmem:[#allocation2] sm:$0xf]  }
   0xd   :  { %v7_v5 = vld [vmem:[#allocation2] sm:$0xf]   ;;  %p78_p4 = pnand %p77_p3, %p71_p0 }
   0xe   :  { %9 = vst.msk [vmem:[#allocation0] ss:$8 sm:$0xf] %vm8_vm0, %v7_v5   ;;  %17 = vrot.lane.b32.xlu0 %v16_v3, %s96_s9  ;;  %v34_v6 = vld [vmem:[#allocation2] sm:$0xf]  }
   0xf   :  { %29 = vrot.lane.b32.xlu1 %v28_v4, %s97_s10  ;;  %v40_v7 = vld [vmem:[#allocation2] sm:$0xf]  }
  0x10   :  { %v46_v8 = vld [vmem:[#allocation2] sm:$0xf]  }
  0x12   :  { %35 = vrot.lane.b32.xlu0 %v34_v6, %s98_s11 }
  0x13   :  { %41 = vrot.lane.b32.xlu1 %v40_v7, %s99_s12 }
  0x16   :  { %47 = vrot.lane.b32.xlu0 %v46_v8, %s100_s13 }
  0x7c   :  { %v12_v9 = vpop.permute.xlu0 %11  }
  0x7d   :  { %v24_v10 = vpop.permute.xlu1 %23   ;;  %15 = vst.msk [vmem:[#allocation0 + $0x1] ss:$8 sm:$0xf] %vm8_vm0, %v12_v9  }
  0x7e   :  { %27 = vst.msk [vmem:[#allocation0 + $0x3] ss:$8 sm:$0xf] %vm8_vm0, %v24_v10  }
  0x80   :  { %v18_v11 = vpop.permute.xlu0 %17  }
  0x81   :  { %v30_v12 = vpop.permute.xlu1 %29   ;;  %21 = vst.msk [vmem:[#allocation0 + $0x2] ss:$8 sm:$0xf] %vm8_vm0, %v18_v11  }
  0x82   :  { %33 = vst.msk [vmem:[#allocation0 + $0x4] ss:$8 sm:$0xf] %vm8_vm0, %v30_v12  }
  0x84   :  { %v36_v13 = vpop.permute.xlu0 %35  }
  0x85   :  { %v42_v14 = vpop.permute.xlu1 %41   ;;  %39 = vst.msk [vmem:[#allocation0 + $0x5] ss:$8 sm:$0xf] %vm8_vm0, %v36_v13  }
  0x86   :  { %45 = vst.msk [vmem:[#allocation0 + $0x6] ss:$8 sm:$0xf] %vm8_vm0, %v42_v14  }
  0x88   :  { %v48_v15 = vpop.permute.xlu0 %47  }
  0x89   :  { %51 = vst.msk [vmem:[#allocation0 + $0x7] ss:$8 sm:$0xf] %vm8_vm0, %v48_v15  }
  0x8a   :  { %81 = shalt.err (!%p78_p4)
}
  0x8b   :  { %s82_s19 = scalar_lea.hbm %s136_s1, 512 }
  0x8c   :  { %p83_p5 = scmp.ne.s32.totalorder %s136_s1, %s82_s19  ;;  %p86_p6 = scmp.lt.u32.totalorder %s82_s19, %s136_s1 }
  0x8e   :  { %p88_p7 = pnand %p86_p6, %p83_p5 }
  0x90   :  { %91 = shalt.err (!%p88_p7)
}
  0x91   :  { %59 = dma.vmem_to_hbm [thread:$0]  %s57_s15, 512, %s136_s1, [#allocation1]  }
  0x92   :  { %92 = dma.done.wait [#allocation1], 512  }
  0x93   :  { %93 = vsyncadd [#allocation1], 4294966784 }
  0x94   :  { %61 = vsyncpa [#allocation1], 1 }

// kernel: pixel_discriminator.2
= control target key start
LH: loop header
LB: loop body
LE: loop exit
PB: predicated region body
PF: predicated region fallthrough
CT: control target
= control target key end

     0   :  { %vm104_vm0 = vcmask 1043456   ;;  %v1192_v2 = vmov 0.0   ;;  %v1193_v5 = vmov 0   ;;  %vm79_vm1 = vcmask 31744   ;;  %s1615_s0 = inlined_call_operand.vmem [shape: f32[4,512], index: 0, kind: input, shape index: {}]   ;;  %s1616_s1 = inlined_call_operand.vmem [shape: f32[64,4], index: 1, kind: input, shape index: {}]   ;;  %s1617_s2 = inlined_call_operand.vmem [shape: f32[64,1], index: 2, kind: input, shape index: {}]   ;;  %s1618_s3 = inlined_call_operand.vmem [shape: f32[128,64], index: 3, kind: input, shape index: {}]   ;;  %s1619_s4 = inlined_call_operand.vmem [shape: f32[128,128], index: 4, kind: output, shape index: {}]  }
   0x1   :  { %v17_v0 = vld [vmem:[%s1615_s0] sm:$0xff]  ;;  %v18_v1 = vld [vmem:[%s1615_s0 + $0x8] sm:$0xff]  ;;  %177 = vmatprep.mubr.f32.mxu0 %v1192_v2  ;;  %290 = vmatprep.mubr.f32.mxu1 %v1192_v2  ;;  %v29_v8 = vld [vmem:[%s1617_s2 + $0x10] sm:$0xff] }
   0x2   :  { %v77_v3 = vcombine.high %v17_v0, %v17_v0  ;;  %v78_v4 = vcombine.high %v18_v1, %v18_v1  ;;  %1188 = vset.pattern.permute.xlu0 %v1193_v5  ;;  %1189 = vset.pattern.permute.xlu1 %v1193_v5  ;;  %v19_v6 = vld [vmem:[%s1616_s1] sm:$0xff]  ;;  %v20_v9 = vld [vmem:[%s1616_s1 + $0x8] sm:$0xff]  ;;  %v30_v11 = vld [vmem:[%s1617_s2 + $0x18] sm:$0xff] }
   0x3   :  { %v27_v7 = vld [vmem:[%s1617_s2] sm:$0xff]  ;;  %47 = vperm.xlu1 %1189, %v29_v8   ;;  %v28_v10 = vld [vmem:[%s1617_s2 + $0x8] sm:$0xff]  ;;  %v21_v12 = vld [vmem:[%s1616_s1 + $0x10] sm:$0xff] }
   0x4   :  { %1102 = vmatprep.subr.msk.mxu0 %vm104_vm0, %v77_v3  ;;  %1112 = vmatprep.subr.msk.mxu1 %vm104_vm0, %v78_v4  ;;  %v31_v13 = vld [vmem:[%s1617_s2 + $0x20] sm:$0xff]  ;;  %v32_v14 = vld [vmem:[%s1617_s2 + $0x28] sm:$0xff]  ;;  %v22_v15 = vld [vmem:[%s1616_s1 + $0x18] sm:$0xff] }
   0x5   :  { %1103 = vmatpush1.msk.msra.mxu0 %vm104_vm0, %v17_v0  ;;  %1113 = vmatpush1.msk.msra.mxu1 %vm104_vm0, %v18_v1  ;;  %v33_v16 = vld [vmem:[%s1617_s2 + $0x30] sm:$0xff]  ;;  %v34_v17 = vld [vmem:[%s1617_s2 + $0x38] sm:$0xff]  ;;  %v23_v18 = vld [vmem:[%s1616_s1 + $0x20] sm:$0xff] }
   0x6   :  { %1104 = vmatmul.mubr.msk.f32.vlgmr.msra.gmra.mrb[0].mxu0 %vm79_vm1, %v19_v6  ;;  %1114 = vmatmul.mubr.msk.f32.vlgmr.msra.gmra.mrb[0].mxu1 %vm79_vm1, %v19_v6  ;;  %v24_v19 = vld [vmem:[%s1616_s1 + $0x28] sm:$0xff]  ;;  %v25_v20 = vld [vmem:[%s1616_s1 + $0x30] sm:$0xff]  ;;  %v26_v21 = vld [vmem:[%s1616_s1 + $0x38] sm:$0xff] }
   0x7   :  { %183 = vmatprep.mubr.f32.mxu0 %v1192_v2  ;;  %296 = vmatprep.mubr.f32.mxu1 %v1192_v2 }
   0x8   :  { %37 = vperm.xlu0 %1188, %v27_v7   ;;  %52 = vperm.xlu1 %1189, %v30_v11  }
   0xa   :  { %1105 = vmatmul.mubr.msk.f32.gmra.mrb[2].mxu0 %vm79_vm1, %v20_v9  ;;  %1115 = vmatmul.mubr.msk.f32.gmra.mrb[2].mxu1 %vm79_vm1, %v20_v9 }
   0xb   :  { %189 = vmatprep.mubr.f32.mxu0 %v1192_v2  ;;  %302 = vmatprep.mubr.f32.mxu1 %v1192_v2 }
   0xc   :  { %42 = vperm.xlu0 %1188, %v28_v10   ;;  %62 = vperm.xlu1 %1189, %v32_v14  }
   0xe   :  { %1106 = vmatmul.mubr.msk.f32.gmra.mrb[4].mxu0 %vm79_vm1, %v21_v12  ;;  %1116 = vmatmul.mubr.msk.f32.gmra.mrb[4].mxu1 %vm79_vm1, %v21_v12 }
   0xf   :  { %195 = vmatprep.mubr.f32.mxu0 %v1192_v2  ;;  %308 = vmatprep.mubr.f32.mxu1 %v1192_v2 }
  0x10   :  { %57 = vperm.xlu0 %1188, %v31_v13   ;;  %72 = vperm.xlu1 %1189, %v34_v17  }
  0x12   :  { %1107 = vmatmul.mubr.msk.f32.gmra.mrb[6].mxu0 %vm79_vm1, %v22_v15  ;;  %1117 = vmatmul.mubr.msk.f32.gmra.mrb[6].mxu1 %vm79_vm1, %v22_v15 }
  0x13   :  { %201 = vmatprep.mubr.f32.mxu0 %v1192_v2  ;;  %314 = vmatprep.mubr.f32.mxu1 %v1192_v2 }
  0x14   :  { %67 = vperm.xlu0 %1188, %v33_v16  }
  0x16   :  { %1108 = vmatmul.mubr.msk.f32.gmra.mrb[8].mxu0 %vm79_vm1, %v23_v18  ;;  %1118 = vmatmul.mubr.msk.f32.gmra.mrb[8].mxu1 %vm79_vm1, %v23_v18 }
  0x17   :  { %207 = vmatprep.mubr.f32.mxu0 %v1192_v2  ;;  %320 = vmatprep.mubr.f32.mxu1 %v1192_v2 }
  0x1a   :  { %1109 = vmatmul.mubr.msk.f32.gmra.mrb[10].mxu0 %vm79_vm1, %v24_v19  ;;  %1119 = vmatmul.mubr.msk.f32.gmra.mrb[10].mxu1 %vm79_vm1, %v24_v19 }
  0x1b   :  { %213 = vmatprep.mubr.f32.mxu0 %v1192_v2  ;;  %326 = vmatprep.mubr.f32.mxu1 %v1192_v2 }
  0x1e   :  { %1110 = vmatmul.mubr.msk.f32.gmra.mrb[12].mxu0 %vm79_vm1, %v25_v20  ;;  %1120 = vmatmul.mubr.msk.f32.gmra.mrb[12].mxu1 %vm79_vm1, %v25_v20 }
  0x1f   :  { %219 = vmatprep.mubr.f32.mxu0 %v1192_v2  ;;  %332 = vmatprep.mubr.f32.mxu1 %v1192_v2 }
  0x22   :  { %1111 = vmatmul.mubr.msk.f32.gmra.mrb[14].mxu0 %vm79_vm1, %v26_v21  ;;  %1121 = vmatmul.mubr.msk.f32.gmra.mrb[14].mxu1 %vm79_vm1, %v26_v21 }
  0x23   :  { %564 = vmatprep.mubr.f32.mxu0 %v1192_v2  ;;  %725 = vmatprep.mubr.f32.mxu1 %v1192_v2 }
  0x82   :  { %v48_v31 = vpop.permute.xlu1 %47 }
  0x87   :  { %v38_v22 = vpop.permute.xlu0 %37  ;;  %v53_v49 = vpop.permute.xlu1 %52 }
  0x8b   :  { %v43_v30 = vpop.permute.xlu0 %42 }
  0xd9   :  { %v179_v23 = vpop.f32.mrb[0].mxu0  ;;  %v292_v24 = vpop.f32.mrb[0].mxu1 }
  0xda   :  { %v180_v25 = vadd.f32 %v179_v23, %v38_v22  ;;  %v293_v26 = vadd.f32 %v292_v24, %v38_v22  ;;  %v181_v27 = vpop.f32.mrb[1].mxu0  ;;  %v294_v28 = vpop.f32.mrb[1].mxu1 }
  0xdb   :  { %v182_v29 = vadd.f32 %v181_v27, %v38_v22  ;;  %v295_v32 = vadd.f32 %v294_v28, %v38_v22  ;;  %v58_v22 = vpop.permute.xlu0 %57  ;;  %v63_v23 = vpop.permute.xlu1 %62 }
  0xdc   :  { %v371_v33 = vmul.f32 0.2, %v180_v25  ;;  %vm339_vm2 = vcmp.gt.f32.partialorder %v180_v25, 0.0  ;;  %vm341_vm3 = vcmp.gt.f32.partialorder %v293_v26, 0.0  ;;  %v373_v34 = vmul.f32 0.2, %v293_v26 }
  0xdd   :  { %v185_v35 = vpop.f32.mrb[2].mxu0  ;;  %v298_v36 = vpop.f32.mrb[2].mxu1  ;;  %vm340_vm4 = vcmp.gt.f32.partialorder %v182_v29, 0.0  ;;  %v372_v37 = vmul.f32 0.2, %v182_v29  ;;  %vm342_vm5 = vcmp.gt.f32.partialorder %v295_v32, 0.0 }
  0xde   :  { %v186_v38 = vadd.f32 %v185_v35, %v43_v30  ;;  %v299_v39 = vadd.f32 %v298_v36, %v43_v30  ;;  %v187_v40 = vpop.f32.mrb[3].mxu0  ;;  %v300_v41 = vpop.f32.mrb[3].mxu1  ;;  %v374_v42 = vmul.f32 0.2, %v295_v32  ;;  %v403_v47 = vsel %vm339_vm2, %v180_v25, %v371_v33 }
  0xdf   :  { %v188_v43 = vadd.f32 %v187_v40, %v43_v30  ;;  %v301_v44 = vadd.f32 %v300_v41, %v43_v30  ;;  %v405_v48 = vsel %vm341_vm3, %v293_v26, %v373_v34  ;;  %v404_v3 = vsel %vm340_vm4, %v182_v29, %v372_v37 }
  0xe0   :  { %vm343_vm6 = vcmp.gt.f32.partialorder %v186_v38, 0.0  ;;  %v375_v45 = vmul.f32 0.2, %v186_v38  ;;  %vm345_vm7 = vcmp.gt.f32.partialorder %v299_v39, 0.0  ;;  %v377_v46 = vmul.f32 0.2, %v299_v39 }
  0xe1   :  { %v376_v50 = vmul.f32 0.2, %v188_v43  ;;  %v378_v51 = vmul.f32 0.2, %v301_v44  ;;  %vm344_vm8 = vcmp.gt.f32.partialorder %v188_v43, 0.0  ;;  %vm346_vm9 = vcmp.gt.f32.partialorder %v301_v44, 0.0 }
  0xe2   :  { %v407_v52 = vsel %vm343_vm6, %v186_v38, %v375_v45  ;;  %v409_v53 = vsel %vm345_vm7, %v299_v39, %v377_v46  ;;  %v191_v54 = vpop.f32.mrb[4].mxu0  ;;  %v304_v55 = vpop.f32.mrb[4].mxu1  ;;  %v406_v5 = vsel %vm342_vm5, %v295_v32, %v374_v42 }
  0xe3   :  { %v1156_v56 = vpack.c.bf16 %v407_v52, %v403_v47  ;;  %v1172_v57 = vpack.c.bf16 %v409_v53, %v405_v48  ;;  %v192_v58 = vadd.f32 %v191_v54, %v48_v31  ;;  %v305_v59 = vadd.f32 %v304_v55, %v48_v31  ;;  %v193_v60 = vpop.f32.mrb[5].mxu0  ;;  %v306_v61 = vpop.f32.mrb[5].mxu1 }
  0xe4   :  { %v1313_v62 = vadd.f32 %v193_v60, %v48_v31  ;;  %v1315_v63 = vadd.f32 %v306_v61, %v48_v31  ;;  %v408_v4 = vsel %vm344_vm8, %v188_v43, %v376_v50  ;;  %v410_v6 = vsel %vm346_vm9, %v301_v44, %v378_v51 }
  0xe5   :  { %v197_v0 = vpop.f32.mrb[6].mxu0  ;;  %v310_v1 = vpop.f32.mrb[6].mxu1  ;;  %vm347_vm10 = vcmp.gt.f32.partialorder %v192_v58, 0.0  ;;  %v379_v7 = vmul.f32 0.2, %v192_v58  ;;  %vm349_vm11 = vcmp.gt.f32.partialorder %v305_v59, 0.0  ;;  %v1154_v16 = vpack.c.bf16 %v408_v4, %v404_v3 }
  0xe6   :  { %v381_v8 = vmul.f32 0.2, %v305_v59  ;;  %vm348_vm12 = vcmp.gt.f32.partialorder %v1313_v62, 0.0  ;;  %v380_v9 = vmul.f32 0.2, %v1313_v62  ;;  %vm350_vm13 = vcmp.gt.f32.partialorder %v1315_v63, 0.0  ;;  %v73_v3 = vpop.permute.xlu1 %72 }
  0xe7   :  { %v198_v10 = vadd.f32 %v197_v0, %v53_v49  ;;  %v311_v11 = vadd.f32 %v310_v1, %v53_v49  ;;  %v199_v12 = vpop.f32.mrb[7].mxu0  ;;  %v312_v13 = vpop.f32.mrb[7].mxu1  ;;  %v1325_v14 = vmul.f32 0.2, %v1315_v63  ;;  %v1170_v17 = vpack.c.bf16 %v410_v6, %v406_v5  ;;  %1155 = vmatprep.subr.bf16.mxu0 %v1154_v16 }
  0xe8   :  { %v200_v15 = vadd.f32 %v199_v12, %v53_v49  ;;  %v1328_v24 = vsel %vm347_vm10, %v192_v58, %v379_v7  ;;  %v1331_v25 = vsel %vm349_vm11, %v305_v59, %v381_v8  ;;  %v313_v26 = vadd.f32 %v312_v13, %v53_v49  ;;  %1157 = vmatpush1.bf16.msra.mxu0 %v1156_v56  ;;  %v68_v1 = vpop.permute.xlu0 %67 }
  0xe9   :  { %v203_v18 = vpop.f32.mrb[8].mxu0  ;;  %v316_v19 = vpop.f32.mrb[8].mxu1  ;;  %vm351_vm14 = vcmp.gt.f32.partialorder %v198_v10, 0.0  ;;  %v383_v20 = vmul.f32 0.2, %v198_v10  ;;  %vm353_vm15 = vcmp.gt.f32.partialorder %v311_v11, 0.0  ;;  %1171 = vmatprep.subr.bf16.mxu1 %v1170_v17  ;;  %v412_v56 = vsel %vm348_vm12, %v1313_v62, %v380_v9 }
  0xea   :  { %v385_v21 = vmul.f32 0.2, %v311_v11  ;;  %vm352_vm0 = vcmp.gt.f32.partialorder %v200_v15, 0.0  ;;  %v384_v29 = vmul.f32 0.2, %v200_v15  ;;  %1173 = vmatpush1.bf16.msra.mxu1 %v1172_v57  ;;  %v204_v30 = vadd.f32 %v203_v18, %v58_v22  ;;  %v205_v31 = vpop.f32.mrb[9].mxu0 }
  0xeb   :  { %v1333_v27 = vsel %vm351_vm14, %v198_v10, %v383_v20  ;;  %v318_v32 = vpop.f32.mrb[9].mxu1  ;;  %v317_v35 = vadd.f32 %v316_v19, %v58_v22  ;;  %v1341_v36 = vadd.f32 %v205_v31, %v58_v22  ;;  %vm354_vm2 = vcmp.gt.f32.partialorder %v313_v26, 0.0 }
  0xec   :  { %v1335_v28 = vsel %vm353_vm15, %v311_v11, %v385_v21  ;;  %v1160_v33 = vpack.c.bf16 %v1333_v27, %v1328_v24  ;;  %vm355_vm1 = vcmp.gt.f32.partialorder %v204_v30, 0.0  ;;  %v387_v39 = vmul.f32 0.2, %v204_v30 }
  0xed   :  { %v1176_v34 = vpack.c.bf16 %v1335_v28, %v1331_v25  ;;  %v209_v37 = vpop.f32.mrb[10].mxu0  ;;  %v322_v38 = vpop.f32.mrb[10].mxu1  ;;  %v1343_v40 = vadd.f32 %v318_v32, %v58_v22  ;;  %v386_v44 = vmul.f32 0.2, %v313_v26  ;;  %vm357_vm3 = vcmp.gt.f32.partialorder %v317_v35, 0.0 }
  0xee   :  { %v210_v41 = vadd.f32 %v209_v37, %v63_v23  ;;  %v211_v42 = vpop.f32.mrb[11].mxu0  ;;  %v324_v43 = vpop.f32.mrb[11].mxu1  ;;  %v389_v45 = vmul.f32 0.2, %v317_v35  ;;  %v1345_v46 = vsel %vm355_vm1, %v204_v30, %v387_v39  ;;  %vm356_vm4 = vcmp.gt.f32.partialorder %v1341_v36, 0.0 }
  0xef   :  { %v388_v47 = vmul.f32 0.2, %v1341_v36  ;;  %v1350_v48 = vmul.f32 0.2, %v1343_v40  ;;  %v323_v50 = vadd.f32 %v322_v38, %v63_v23  ;;  %v212_v51 = vadd.f32 %v211_v42, %v63_v23 }
  0xf0   :  { %vm359_vm5 = vcmp.gt.f32.partialorder %v210_v41, 0.0  ;;  %v391_v49 = vmul.f32 0.2, %v210_v41  ;;  %v1352_v54 = vsel %vm357_vm3, %v317_v35, %v389_v45  ;;  %v1354_v55 = vadd.f32 %v324_v43, %v63_v23 }
  0xf1   :  { %v215_v52 = vpop.f32.mrb[12].mxu0  ;;  %v328_v53 = vpop.f32.mrb[12].mxu1  ;;  %v416_v57 = vsel %vm352_vm0, %v200_v15, %v384_v29  ;;  %vm358_vm6 = vcmp.gt.f32.partialorder %v1343_v40, 0.0  ;;  %vm361_vm7 = vcmp.gt.f32.partialorder %v323_v50, 0.0  ;;  %v393_v61 = vmul.f32 0.2, %v323_v50 }
  0xf2   :  { %v217_v58 = vpop.f32.mrb[13].mxu0  ;;  %v330_v59 = vpop.f32.mrb[13].mxu1  ;;  %v1361_v60 = vsel %vm359_vm5, %v210_v41, %v391_v49  ;;  %v414_v0 = vsel %vm350_vm13, %v1315_v63, %v1325_v14  ;;  %vm360_vm8 = vcmp.gt.f32.partialorder %v212_v51, 0.0  ;;  %v392_v4 = vmul.f32 0.2, %v212_v51 }
  0xf3   :  { %v1164_v62 = vpack.c.bf16 %v1361_v60, %v1345_v46  ;;  %vm362_vm9 = vcmp.gt.f32.partialorder %v1354_v55, 0.0  ;;  %v425_v5 = vsel %vm361_vm7, %v323_v50, %v393_v61  ;;  %v1158_v6 = vpack.c.bf16 %v416_v57, %v412_v56  ;;  %v437_v50 = vld [vmem:[%s1618_s3 + $0x10] sm:$0xff]  ;;  %v443_v56 = vld [vmem:[%s1618_s3 + $0x40] sm:$0xff]  ;;  %v444_v57 = vld [vmem:[%s1618_s3 + $0x48] sm:$0xff] }
  0xf4   :  { %v418_v7 = vsel %vm354_vm2, %v313_v26, %v386_v44  ;;  %v216_v8 = vadd.f32 %v215_v52, %v68_v1  ;;  %v1180_v11 = vpack.c.bf16 %v425_v5, %v1352_v54  ;;  %v329_v63 = vadd.f32 %v328_v53, %v68_v1  ;;  %v439_v52 = vld [vmem:[%s1618_s3 + $0x20] sm:$0xff]  ;;  %v440_v53 = vld [vmem:[%s1618_s3 + $0x28] sm:$0xff]  ;;  %v441_v54 = vld [vmem:[%s1618_s3 + $0x30] sm:$0xff] }
  0xf5   :  { %v221_v9 = vpop.f32.mrb[14].mxu0  ;;  %v334_v10 = vpop.f32.mrb[14].mxu1  ;;  %v1174_v12 = vpack.c.bf16 %v418_v7, %v414_v0  ;;  %v218_v13 = vadd.f32 %v217_v58, %v68_v1  ;;  %1159 = vmatprep.subr.bf16.mxu0 %v1158_v6  ;;  %v331_v17 = vadd.f32 %v330_v59, %v68_v1  ;;  %v394_v19 = vmul.f32 0.2, %v1354_v55  ;;  %v445_v58 = vld [vmem:[%s1618_s3 + $0x50] sm:$0xff]  ;;  %v446_v59 = vld [vmem:[%s1618_s3 + $0x58] sm:$0xff] }
  0xf6   :  { %v223_v14 = vpop.f32.mrb[15].mxu0  ;;  %v336_v15 = vpop.f32.mrb[15].mxu1  ;;  %vm363_vm10 = vcmp.gt.f32.partialorder %v216_v8, 0.0  ;;  %v395_v16 = vmul.f32 0.2, %v216_v8  ;;  %v222_v18 = vadd.f32 %v221_v9, %v73_v3  ;;  %1161 = vmatpush1.bf16.msra.mxu0 %v1160_v33  ;;  %vm365_vm11 = vcmp.gt.f32.partialorder %v329_v63, 0.0 }
  0xf7   :  { %1175 = vmatprep.subr.bf16.mxu1 %v1174_v12  ;;  %v397_v20 = vmul.f32 0.2, %v329_v63  ;;  %vm364_vm12 = vcmp.gt.f32.partialorder %v218_v13, 0.0  ;;  %v396_v22 = vmul.f32 0.2, %v218_v13  ;;  %vm366_vm13 = vcmp.gt.f32.partialorder %v331_v17, 0.0 }
  0xf8   :  { %1177 = vmatpush1.bf16.msra.mxu1 %v1176_v34  ;;  %v427_v21 = vsel %vm363_vm10, %v216_v8, %v395_v16  ;;  %vm367_vm14 = vcmp.gt.f32.partialorder %v222_v18, 0.0  ;;  %v398_v23 = vmul.f32 0.2, %v331_v17  ;;  %v399_v24 = vmul.f32 0.2, %v222_v18  ;;  %v447_v60 = vld [vmem:[%s1618_s3 + $0x60] sm:$0xff] }
  0xf9   :  { %v335_v26 = vadd.f32 %v334_v10, %v73_v3  ;;  %v224_v27 = vadd.f32 %v223_v14, %v73_v3  ;;  %v429_v29 = vsel %vm365_vm11, %v329_v63, %v397_v20  ;;  %v337_v30 = vadd.f32 %v336_v15, %v73_v3  ;;  %v448_v61 = vld [vmem:[%s1618_s3 + $0x68] sm:$0xff]  ;;  %v449_v0 = vld [vmem:[%s1618_s3 + $0x70] sm:$0xff]  ;;  %v450_v1 = vld [vmem:[%s1618_s3 + $0x78] sm:$0xff] }
  0xfa   :  { %v420_v31 = vsel %vm356_vm4, %v1341_v36, %v388_v47  ;;  %v424_v32 = vsel %vm360_vm8, %v212_v51, %v392_v4  ;;  %v431_v33 = vsel %vm367_vm14, %v222_v18, %v399_v24  ;;  %v422_v39 = vsel %vm358_vm6, %v1343_v40, %v1350_v48  ;;  %v435_v40 = vld [vmem:[%s1618_s3] sm:$0xff]  ;;  %v436_v48 = vld [vmem:[%s1618_s3 + $0x8] sm:$0xff]  ;;  %v438_v51 = vld [vmem:[%s1618_s3 + $0x18] sm:$0xff] }
  0xfb   :  { %vm369_vm15 = vcmp.gt.f32.partialorder %v335_v26, 0.0  ;;  %v401_v25 = vmul.f32 0.2, %v335_v26  ;;  %vm368_vm0 = vcmp.gt.f32.partialorder %v224_v27, 0.0  ;;  %v1168_v28 = vpack.c.bf16 %v431_v33, %v427_v21 }
  0xfc   :  { %v400_v34 = vmul.f32 0.2, %v224_v27  ;;  %vm370_vm1 = vcmp.gt.f32.partialorder %v337_v30, 0.0  ;;  %v402_v35 = vmul.f32 0.2, %v337_v30  ;;  %v1162_v38 = vpack.c.bf16 %v424_v32, %v420_v31 }
  0xfd   :  { %v433_v37 = vsel %vm369_vm15, %v335_v26, %v401_v25  ;;  %v426_v36 = vsel %vm362_vm9, %v1354_v55, %v394_v19  ;;  %v428_v43 = vsel %vm364_vm12, %v218_v13, %v396_v22  ;;  %v430_v46 = vsel %vm366_vm13, %v331_v17, %v398_v23  ;;  %v442_v55 = vld [vmem:[%s1618_s3 + $0x38] sm:$0xff] }
  0xfe   :  { %v1184_v41 = vpack.c.bf16 %v433_v37, %v429_v29  ;;  %v1178_v42 = vpack.c.bf16 %v426_v36, %v422_v39  ;;  %v432_v44 = vsel %vm368_vm0, %v224_v27, %v400_v34  ;;  %1163 = vmatprep.subr.bf16.mxu0 %v1162_v38  ;;  %v434_v47 = vsel %vm370_vm1, %v337_v30, %v402_v35 }
  0xff   :  { %v1166_v45 = vpack.c.bf16 %v432_v44, %v428_v43  ;;  %1165 = vmatpush1.bf16.msra.mxu0 %v1164_v62  ;;  %v1182_v49 = vpack.c.bf16 %v434_v47, %v430_v46  ;;  %vm451_vm2 = vcmask 523264  }
 0x100   :  { %1179 = vmatprep.subr.bf16.mxu1 %v1178_v42 }
 0x101   :  { %1181 = vmatpush1.bf16.msra.mxu1 %v1180_v11  ;;  %1167 = vmatprep.subr.bf16.mxu0 %v1166_v45 }
 0x102   :  { %1183 = vmatprep.subr.bf16.mxu1 %v1182_v49 }
 0x103   :  { %1169 = vmatpush1.bf16.msra.mxu0 %v1168_v28 }
 0x105   :  { %1185 = vmatpush1.bf16.msra.mxu1 %v1184_v41 }
 0x106   :  { %1122 = vmatmul.mubr.msk.f32.vlgmr.msra.gmra.mrb[16].mxu0 %vm451_vm2, %v435_v40 }
 0x107   :  { %570 = vmatprep.mubr.f32.mxu0 %v1192_v2 }
 0x108   :  { %1138 = vmatmul.mubr.msk.f32.vlgmr.msra.gmra.mrb[16].mxu1 %vm451_vm2, %v435_v40 }
 0x109   :  { %731 = vmatprep.mubr.f32.mxu1 %v1192_v2 }
 0x10a   :  { %1123 = vmatmul.mubr.msk.f32.gmra.mrb[18].mxu0 %vm451_vm2, %v436_v48 }
 0x10b   :  { %576 = vmatprep.mubr.f32.mxu0 %v1192_v2 }
 0x10c   :  { %1139 = vmatmul.mubr.msk.f32.gmra.mrb[18].mxu1 %vm451_vm2, %v436_v48 }
 0x10d   :  { %737 = vmatprep.mubr.f32.mxu1 %v1192_v2 }
 0x10e   :  { %1124 = vmatmul.mubr.msk.f32.gmra.mrb[20].mxu0 %vm451_vm2, %v437_v50 }
 0x10f   :  { %582 = vmatprep.mubr.f32.mxu0 %v1192_v2 }
 0x110   :  { %1140 = vmatmul.mubr.msk.f32.gmra.mrb[20].mxu1 %vm451_vm2, %v437_v50 }
 0x111   :  { %743 = vmatprep.mubr.f32.mxu1 %v1192_v2 }
 0x112   :  { %1125 = vmatmul.mubr.msk.f32.gmra.mrb[22].mxu0 %vm451_vm2, %v438_v51 }
 0x113   :  { %588 = vmatprep.mubr.f32.mxu0 %v1192_v2 }
 0x114   :  { %1141 = vmatmul.mubr.msk.f32.gmra.mrb[22].mxu1 %vm451_vm2, %v438_v51 }
 0x115   :  { %749 = vmatprep.mubr.f32.mxu1 %v1192_v2 }
 0x116   :  { %1126 = vmatmul.mubr.msk.f32.gmra.mrb[24].mxu0 %vm451_vm2, %v439_v52 }
 0x117   :  { %594 = vmatprep.mubr.f32.mxu0 %v1192_v2 }
 0x118   :  { %1142 = vmatmul.mubr.msk.f32.gmra.mrb[24].mxu1 %vm451_vm2, %v439_v52 }
 0x119   :  { %755 = vmatprep.mubr.f32.mxu1 %v1192_v2 }
 0x11a   :  { %1127 = vmatmul.mubr.msk.f32.gmra.mrb[26].mxu0 %vm451_vm2, %v440_v53 }
 0x11b   :  { %600 = vmatprep.mubr.f32.mxu0 %v1192_v2 }
 0x11c   :  { %1143 = vmatmul.mubr.msk.f32.gmra.mrb[26].mxu1 %vm451_vm2, %v440_v53 }
 0x11d   :  { %761 = vmatprep.mubr.f32.mxu1 %v1192_v2 }
 0x11e   :  { %1128 = vmatmul.mubr.msk.f32.gmra.mrb[28].mxu0 %vm451_vm2, %v441_v54 }
 0x11f   :  { %606 = vmatprep.mubr.f32.mxu0 %v1192_v2 }
 0x120   :  { %1144 = vmatmul.mubr.msk.f32.gmra.mrb[28].mxu1 %vm451_vm2, %v441_v54 }
 0x121   :  { %767 = vmatprep.mubr.f32.mxu1 %v1192_v2 }
 0x122   :  { %1129 = vmatmul.mubr.msk.f32.gmra.mrb[30].mxu0 %vm451_vm2, %v442_v55 }
 0x123   :  { %612 = vmatprep.mubr.f32.mxu0 %v1192_v2 }
 0x124   :  { %1145 = vmatmul.mubr.msk.f32.gmra.mrb[30].mxu1 %vm451_vm2, %v442_v55 }
 0x125   :  { %773 = vmatprep.mubr.f32.mxu1 %v1192_v2 }
 0x126   :  { %1130 = vmatmul.mubr.msk.f32.gmra.mrb[32].mxu0 %vm451_vm2, %v443_v56 }
 0x127   :  { %618 = vmatprep.mubr.f32.mxu0 %v1192_v2 }
 0x128   :  { %1146 = vmatmul.mubr.msk.f32.gmra.mrb[32].mxu1 %vm451_vm2, %v443_v56 }
 0x129   :  { %779 = vmatprep.mubr.f32.mxu1 %v1192_v2 }
 0x12a   :  { %1131 = vmatmul.mubr.msk.f32.gmra.mrb[34].mxu0 %vm451_vm2, %v444_v57 }
 0x12b   :  { %624 = vmatprep.mubr.f32.mxu0 %v1192_v2 }
 0x12c   :  { %1147 = vmatmul.mubr.msk.f32.gmra.mrb[34].mxu1 %vm451_vm2, %v444_v57 }
 0x12d   :  { %785 = vmatprep.mubr.f32.mxu1 %v1192_v2 }
 0x12e   :  { %1132 = vmatmul.mubr.msk.f32.gmra.mrb[36].mxu0 %vm451_vm2, %v445_v58 }
 0x12f   :  { %630 = vmatprep.mubr.f32.mxu0 %v1192_v2 }
 0x130   :  { %1148 = vmatmul.mubr.msk.f32.gmra.mrb[36].mxu1 %vm451_vm2, %v445_v58 }
 0x131   :  { %791 = vmatprep.mubr.f32.mxu1 %v1192_v2 }
 0x132   :  { %1133 = vmatmul.mubr.msk.f32.gmra.mrb[38].mxu0 %vm451_vm2, %v446_v59 }
 0x133   :  { %636 = vmatprep.mubr.f32.mxu0 %v1192_v2 }
 0x134   :  { %1149 = vmatmul.mubr.msk.f32.gmra.mrb[38].mxu1 %vm451_vm2, %v446_v59 }
 0x135   :  { %797 = vmatprep.mubr.f32.mxu1 %v1192_v2 }
 0x136   :  { %1134 = vmatmul.mubr.msk.f32.gmra.mrb[40].mxu0 %vm451_vm2, %v447_v60 }
 0x137   :  { %642 = vmatprep.mubr.f32.mxu0 %v1192_v2 }
 0x138   :  { %1150 = vmatmul.mubr.msk.f32.gmra.mrb[40].mxu1 %vm451_vm2, %v447_v60 }
 0x139   :  { %803 = vmatprep.mubr.f32.mxu1 %v1192_v2 }
 0x13a   :  { %1135 = vmatmul.mubr.msk.f32.gmra.mrb[42].mxu0 %vm451_vm2, %v448_v61 }
 0x13b   :  { %648 = vmatprep.mubr.f32.mxu0 %v1192_v2 }
 0x13c   :  { %1151 = vmatmul.mubr.msk.f32.gmra.mrb[42].mxu1 %vm451_vm2, %v448_v61 }
 0x13d   :  { %809 = vmatprep.mubr.f32.mxu1 %v1192_v2 }
 0x13e   :  { %1136 = vmatmul.mubr.msk.f32.gmra.mrb[44].mxu0 %vm451_vm2, %v449_v0 }
 0x13f   :  { %654 = vmatprep.mubr.f32.mxu0 %v1192_v2 }
 0x140   :  { %1152 = vmatmul.mubr.msk.f32.gmra.mrb[44].mxu1 %vm451_vm2, %v449_v0 }
 0x141   :  { %815 = vmatprep.mubr.f32.mxu1 %v1192_v2 }
 0x142   :  { %1137 = vmatmul.mubr.msk.f32.gmra.mrb[46].mxu0 %vm451_vm2, %v450_v1 }
 0x144   :  { %1153 = vmatmul.mubr.msk.f32.gmra.mrb[46].mxu1 %vm451_vm2, %v450_v1 }
 0x1d9   :  { %v566_v3 = vpop.f32.mrb[16].mxu0 }
 0x1da   :  { %v902_v62 = vmul.f32 %v566_v3, %v566_v3  ;;  %v568_v4 = vpop.f32.mrb[17].mxu0 }
 0x1db   :  { %v727_v5 = vpop.f32.mrb[16].mxu1  ;;  %v822_v6 = vadd.f32 %v568_v4, %v566_v3  ;;  %v903_v7 = vmul.f32 %v568_v4, %v568_v4 }
 0x1dc   :  { %v729_v8 = vpop.f32.mrb[17].mxu1  ;;  %v904_v9 = vmul.f32 %v727_v5, %v727_v5 }
 0x1dd   :  { %v966_v10 = vadd.f32 %v903_v7, %v902_v62  ;;  %v823_v11 = vadd.f32 %v822_v6, %v727_v5  ;;  %v572_v12 = vpop.f32.mrb[18].mxu0  ;;  %v905_v18 = vmul.f32 %v729_v8, %v729_v8 }
 0x1de   :  { %v906_v63 = vmul.f32 %v572_v12, %v572_v12  ;;  %v574_v13 = vpop.f32.mrb[19].mxu0 }
 0x1df   :  { %v733_v14 = vpop.f32.mrb[18].mxu1  ;;  %v827_v15 = vadd.f32 %v574_v13, %v572_v12  ;;  %v907_v2 = vmul.f32 %v574_v13, %v574_v13  ;;  %v824_v16 = vadd.f32 %v823_v11, %v729_v8  ;;  %v967_v20 = vadd.f32 %v966_v10, %v904_v9 }
 0x1e0   :  { %v735_v17 = vpop.f32.mrb[19].mxu1  ;;  %v908_v19 = vmul.f32 %v733_v14, %v733_v14 }
 0x1e1   :  { %v971_v21 = vadd.f32 %v907_v2, %v906_v63  ;;  %v828_v22 = vadd.f32 %v827_v15, %v733_v14  ;;  %825 = vadd.xlane.f32.xlu0 %v824_v16  ;;  %v578_v23 = vpop.f32.mrb[20].mxu0  ;;  %v968_v24 = vadd.f32 %v967_v20, %v905_v18  ;;  %v909_v25 = vmul.f32 %v735_v17, %v735_v17 }
 0x1e2   :  { %v910_v26 = vmul.f32 %v578_v23, %v578_v23  ;;  %v580_v27 = vpop.f32.mrb[21].mxu0 }
 0x1e3   :  { %v739_v29 = vpop.f32.mrb[20].mxu1  ;;  %v832_v30 = vadd.f32 %v580_v27, %v578_v23  ;;  %v911_v31 = vmul.f32 %v580_v27, %v580_v27  ;;  %v829_v32 = vadd.f32 %v828_v22, %v735_v17  ;;  %969 = vadd.xlane.f32.xlu1 %v968_v24  ;;  %v972_v34 = vadd.f32 %v971_v21, %v908_v19 }
 0x1e4   :  { %v741_v33 = vpop.f32.mrb[21].mxu1  ;;  %v912_v28 = vmul.f32 %v739_v29, %v739_v29 }
 0x1e5   :  { %v976_v35 = vadd.f32 %v911_v31, %v910_v26  ;;  %830 = vadd.xlane.f32.xlu0 %v829_v32  ;;  %v584_v37 = vpop.f32.mrb[22].mxu0  ;;  %v833_v38 = vadd.f32 %v832_v30, %v739_v29  ;;  %v973_v42 = vadd.f32 %v972_v34, %v909_v25  ;;  %v913_v49 = vmul.f32 %v741_v33, %v741_v33 }
 0x1e6   :  { %v914_v39 = vmul.f32 %v584_v37, %v584_v37  ;;  %v586_v36 = vpop.f32.mrb[23].mxu0 }
 0x1e7   :  { %v745_v41 = vpop.f32.mrb[22].mxu1  ;;  %v837_v43 = vadd.f32 %v586_v36, %v584_v37  ;;  %v915_v44 = vmul.f32 %v586_v36, %v586_v36  ;;  %v834_v47 = vadd.f32 %v833_v38, %v741_v33  ;;  %v977_v40 = vadd.f32 %v976_v35, %v912_v28 }
 0x1e8   :  { %v916_v45 = vmul.f32 %v745_v41, %v745_v41  ;;  %v747_v46 = vpop.f32.mrb[23].mxu1 }
 0x1e9   :  { %v981_v48 = vadd.f32 %v915_v44, %v914_v39  ;;  %v838_v50 = vadd.f32 %v837_v43, %v745_v41  ;;  %974 = vadd.xlane.f32.xlu0 %v973_v42  ;;  %v590_v51 = vpop.f32.mrb[24].mxu0  ;;  %835 = vadd.xlane.f32.xlu1 %v834_v47  ;;  %v978_v54 = vadd.f32 %v977_v40, %v913_v49 }
 0x1ea   :  { %v918_v52 = vmul.f32 %v590_v51, %v590_v51  ;;  %v592_v53 = vpop.f32.mrb[25].mxu0  ;;  %v917_v56 = vmul.f32 %v747_v46, %v747_v46 }
 0x1eb   :  { %v751_v55 = vpop.f32.mrb[24].mxu1  ;;  %v842_v57 = vadd.f32 %v592_v53, %v590_v51  ;;  %v919_v58 = vmul.f32 %v592_v53, %v592_v53  ;;  %v982_v60 = vadd.f32 %v981_v48, %v916_v45  ;;  %v839_v0 = vadd.f32 %v838_v50, %v747_v46 }
 0x1ec   :  { %v753_v59 = vpop.f32.mrb[25].mxu1  ;;  %v920_v61 = vmul.f32 %v751_v55, %v751_v55 }
 0x1ed   :  { %v986_v1 = vadd.f32 %v919_v58, %v918_v52  ;;  %979 = vadd.xlane.f32.xlu0 %v978_v54  ;;  %v596_v3 = vpop.f32.mrb[26].mxu0  ;;  %v843_v62 = vadd.f32 %v842_v57, %v751_v55  ;;  %v983_v4 = vadd.f32 %v982_v60, %v917_v56  ;;  %v921_v63 = vmul.f32 %v753_v59, %v753_v59 }
 0x1ee   :  { %v922_v5 = vmul.f32 %v596_v3, %v596_v3  ;;  %v598_v6 = vpop.f32.mrb[27].mxu0 }
 0x1ef   :  { %v757_v7 = vpop.f32.mrb[26].mxu1  ;;  %v847_v8 = vadd.f32 %v598_v6, %v596_v3  ;;  %v923_v9 = vmul.f32 %v598_v6, %v598_v6  ;;  %984 = vadd.xlane.f32.xlu1 %v983_v4  ;;  %v844_v12 = vadd.f32 %v843_v62, %v753_v59  ;;  %v987_v13 = vadd.f32 %v986_v1, %v920_v61 }
 0x1f0   :  { %v924_v10 = vmul.f32 %v757_v7, %v757_v7  ;;  %v759_v11 = vpop.f32.mrb[27].mxu1 }
 0x1f1   :  { %v991_v14 = vadd.f32 %v923_v9, %v922_v5  ;;  %v848_v15 = vadd.f32 %v847_v8, %v757_v7  ;;  %840 = vadd.xlane.f32.xlu0 %v839_v0  ;;  %v602_v2 = vpop.f32.mrb[28].mxu0  ;;  %v988_v18 = vadd.f32 %v987_v13, %v921_v63  ;;  %v925_v20 = vmul.f32 %v759_v11, %v759_v11 }
 0x1f2   :  { %v926_v16 = vmul.f32 %v602_v2, %v602_v2  ;;  %v604_v17 = vpop.f32.mrb[29].mxu0 }
 0x1f3   :  { %v763_v19 = vpop.f32.mrb[28].mxu1  ;;  %845 = vadd.xlane.f32.xlu1 %v844_v12  ;;  %v852_v21 = vadd.f32 %v604_v17, %v602_v2  ;;  %v927_v22 = vmul.f32 %v604_v17, %v604_v17  ;;  %v992_v24 = vadd.f32 %v991_v14, %v924_v10  ;;  %v849_v27 = vadd.f32 %v848_v15, %v759_v11 }
 0x1f4   :  { %v765_v23 = vpop.f32.mrb[29].mxu1  ;;  %v928_v26 = vmul.f32 %v763_v19, %v763_v19 }
 0x1f5   :  { %v996_v29 = vadd.f32 %v927_v22, %v926_v16  ;;  %989 = vadd.xlane.f32.xlu0 %v988_v18  ;;  %v608_v30 = vpop.f32.mrb[30].mxu0  ;;  %v853_v31 = vadd.f32 %v852_v21, %v763_v19  ;;  %v993_v32 = vadd.f32 %v992_v24, %v925_v20  ;;  %v929_v36 = vmul.f32 %v765_v23, %v765_v23 }
 0x1f6   :  { %v930_v33 = vmul.f32 %v608_v30, %v608_v30  ;;  %v610_v25 = vpop.f32.mrb[31].mxu0 }
 0x1f7   :  { %v769_v28 = vpop.f32.mrb[30].mxu1  ;;  %v857_v34 = vadd.f32 %v610_v25, %v608_v30  ;;  %v931_v35 = vmul.f32 %v610_v25, %v610_v25  ;;  %994 = vadd.xlane.f32.xlu1 %v993_v32  ;;  %v854_v39 = vadd.f32 %v853_v31, %v765_v23  ;;  %v997_v41 = vadd.f32 %v996_v29, %v928_v26 }
 0x1f8   :  { %v932_v37 = vmul.f32 %v769_v28, %v769_v28  ;;  %v771_v38 = vpop.f32.mrb[31].mxu1 }
 0x1f9   :  { %v1001_v42 = vadd.f32 %v931_v35, %v930_v33  ;;  %v858_v43 = vadd.f32 %v857_v34, %v769_v28  ;;  %850 = vadd.xlane.f32.xlu0 %v849_v27  ;;  %v614_v44 = vpop.f32.mrb[32].mxu0  ;;  %v998_v47 = vadd.f32 %v997_v41, %v929_v36  ;;  %v933_v40 = vmul.f32 %v771_v38, %v771_v38 }
 0x1fa   :  { %v934_v45 = vmul.f32 %v614_v44, %v614_v44  ;;  %v616_v46 = vpop.f32.mrb[33].mxu0 }
 0x1fb   :  { %v775_v49 = vpop.f32.mrb[32].mxu1  ;;  %855 = vadd.xlane.f32.xlu1 %v854_v39  ;;  %v862_v48 = vadd.f32 %v616_v46, %v614_v44  ;;  %v935_v50 = vmul.f32 %v616_v46, %v616_v46  ;;  %v1002_v52 = vadd.f32 %v1001_v42, %v932_v37  ;;  %v859_v54 = vadd.f32 %v858_v43, %v771_v38 }
 0x1fc   :  { %v777_v51 = vpop.f32.mrb[33].mxu1  ;;  %v936_v53 = vmul.f32 %v775_v49, %v775_v49 }
 0x1fd   :  { %v1006_v55 = vadd.f32 %v935_v50, %v934_v45  ;;  %999 = vadd.xlane.f32.xlu0 %v998_v47  ;;  %v620_v56 = vpop.f32.mrb[34].mxu0  ;;  %v863_v57 = vadd.f32 %v862_v48, %v775_v49  ;;  %v1003_v58 = vadd.f32 %v1002_v52, %v933_v40  ;;  %v937_v5 = vmul.f32 %v777_v51, %v777_v51 }
 0x1fe   :  { %v938_v59 = vmul.f32 %v620_v56, %v620_v56  ;;  %v622_v60 = vpop.f32.mrb[35].mxu0 }
 0x1ff   :  { %v781_v61 = vpop.f32.mrb[34].mxu1  ;;  %v867_v0 = vadd.f32 %v622_v60, %v620_v56  ;;  %v939_v1 = vmul.f32 %v622_v60, %v622_v60  ;;  %1004 = vadd.xlane.f32.xlu1 %v1003_v58  ;;  %v864_v4 = vadd.f32 %v863_v57, %v777_v51  ;;  %v1007_v6 = vadd.f32 %v1006_v55, %v936_v53 }
 0x200   :  { %v940_v3 = vmul.f32 %v781_v61, %v781_v61  ;;  %v783_v62 = vpop.f32.mrb[35].mxu1 }
 0x201   :  { %v1011_v7 = vadd.f32 %v939_v1, %v938_v59  ;;  %v868_v8 = vadd.f32 %v867_v0, %v781_v61  ;;  %860 = vadd.xlane.f32.xlu0 %v859_v54  ;;  %v626_v9 = vpop.f32.mrb[36].mxu0  ;;  %v1008_v12 = vadd.f32 %v1007_v6, %v937_v5  ;;  %v941_v13 = vmul.f32 %v783_v62, %v783_v62 }
 0x202   :  { %v942_v10 = vmul.f32 %v626_v9, %v626_v9  ;;  %v628_v11 = vpop.f32.mrb[37].mxu0 }
 0x203   :  { %v787_v63 = vpop.f32.mrb[36].mxu1  ;;  %865 = vadd.xlane.f32.xlu1 %v864_v4  ;;  %v872_v14 = vadd.f32 %v628_v11, %v626_v9  ;;  %v943_v15 = vmul.f32 %v628_v11, %v628_v11  ;;  %v1012_v16 = vadd.f32 %v1011_v7, %v940_v3  ;;  %v869_v18 = vadd.f32 %v868_v8, %v783_v62 }
 0x204   :  { %v789_v2 = vpop.f32.mrb[37].mxu1  ;;  %v944_v17 = vmul.f32 %v787_v63, %v787_v63 }
 0x205   :  { %v1016_v19 = vadd.f32 %v943_v15, %v942_v10  ;;  %1009 = vadd.xlane.f32.xlu0 %v1008_v12  ;;  %v632_v20 = vpop.f32.mrb[38].mxu0  ;;  %v873_v21 = vadd.f32 %v872_v14, %v787_v63  ;;  %v1013_v22 = vadd.f32 %v1012_v16, %v941_v13  ;;  %v945_v33 = vmul.f32 %v789_v2, %v789_v2 }
 0x206   :  { %v946_v23 = vmul.f32 %v632_v20, %v632_v20  ;;  %v634_v24 = vpop.f32.mrb[39].mxu0 }
 0x207   :  { %v793_v26 = vpop.f32.mrb[38].mxu1  ;;  %v877_v27 = vadd.f32 %v634_v24, %v632_v20  ;;  %v947_v29 = vmul.f32 %v634_v24, %v634_v24  ;;  %1014 = vadd.xlane.f32.xlu1 %v1013_v22  ;;  %v874_v32 = vadd.f32 %v873_v21, %v789_v2  ;;  %v1017_v25 = vadd.f32 %v1016_v19, %v944_v17 }
 0x208   :  { %v948_v30 = vmul.f32 %v793_v26, %v793_v26  ;;  %v795_v31 = vpop.f32.mrb[39].mxu1 }
 0x209   :  { %v1021_v28 = vadd.f32 %v947_v29, %v946_v23  ;;  %v878_v34 = vadd.f32 %v877_v27, %v793_v26  ;;  %870 = vadd.xlane.f32.xlu0 %v869_v18  ;;  %v638_v35 = vpop.f32.mrb[40].mxu0  ;;  %v1018_v39 = vadd.f32 %v1017_v25, %v945_v33  ;;  %v949_v41 = vmul.f32 %v795_v31, %v795_v31 }
 0x20a   :  { %v950_v37 = vmul.f32 %v638_v35, %v638_v35  ;;  %v640_v38 = vpop.f32.mrb[41].mxu0  ;;  %v1046_v25 = vlaneseq }
 0x20b   :  { %v799_v36 = vpop.f32.mrb[40].mxu1  ;;  %875 = vadd.xlane.f32.xlu1 %v874_v32  ;;  %v882_v42 = vadd.f32 %v640_v38, %v638_v35  ;;  %v951_v43 = vmul.f32 %v640_v38, %v640_v38  ;;  %v1022_v45 = vadd.f32 %v1021_v28, %v948_v30  ;;  %v879_v47 = vadd.f32 %v878_v34, %v795_v31 }
 0x20c   :  { %v801_v44 = vpop.f32.mrb[41].mxu1  ;;  %v952_v46 = vmul.f32 %v799_v36, %v799_v36  ;;  %v1499_v28 = vand.u32 127, %v1046_v25 }
 0x20d   :  { %v1026_v49 = vadd.f32 %v951_v43, %v950_v37  ;;  %1019 = vadd.xlane.f32.xlu0 %v1018_v39  ;;  %v644_v40 = vpop.f32.mrb[42].mxu0  ;;  %v883_v48 = vadd.f32 %v882_v42, %v799_v36  ;;  %v1023_v50 = vadd.f32 %v1022_v45, %v949_v41  ;;  %v953_v59 = vmul.f32 %v801_v44, %v801_v44 }
 0x20e   :  { %v954_v51 = vmul.f32 %v644_v40, %v644_v40  ;;  %v646_v52 = vpop.f32.mrb[43].mxu0  ;;  %vm1049_vm3 = vcmp.eq.s32.totalorder %v1499_v28, 1  ;;  %vm1048_vm4 = vcmp.eq.s32.totalorder %v1499_v28, 0 }
 0x20f   :  { %v805_v53 = vpop.f32.mrb[42].mxu1  ;;  %v887_v54 = vadd.f32 %v646_v52, %v644_v40  ;;  %v955_v55 = vmul.f32 %v646_v52, %v646_v52  ;;  %1024 = vadd.xlane.f32.xlu1 %v1023_v50  ;;  %v884_v58 = vadd.f32 %v883_v48, %v801_v44  ;;  %v1027_v60 = vadd.f32 %v1026_v49, %v952_v46 }
 0x210   :  { %v956_v56 = vmul.f32 %v805_v53, %v805_v53  ;;  %v807_v57 = vpop.f32.mrb[43].mxu1 }
 0x211   :  { %v1031_v61 = vadd.f32 %v955_v55, %v954_v51  ;;  %v888_v0 = vadd.f32 %v887_v54, %v805_v53  ;;  %880 = vadd.xlane.f32.xlu0 %v879_v47  ;;  %v650_v1 = vpop.f32.mrb[44].mxu0  ;;  %v957_v62 = vmul.f32 %v807_v57, %v807_v57  ;;  %v1028_v5 = vadd.f32 %v1027_v60, %v953_v59 }
 0x212   :  { %v958_v3 = vmul.f32 %v650_v1, %v650_v1  ;;  %v652_v4 = vpop.f32.mrb[45].mxu0 }
 0x213   :  { %v811_v6 = vpop.f32.mrb[44].mxu1  ;;  %885 = vadd.xlane.f32.xlu1 %v884_v58  ;;  %v892_v7 = vadd.f32 %v652_v4, %v650_v1  ;;  %v959_v8 = vmul.f32 %v652_v4, %v652_v4  ;;  %v1032_v11 = vadd.f32 %v1031_v61, %v956_v56  ;;  %v889_v12 = vadd.f32 %v888_v0, %v807_v57 }
 0x214   :  { %v960_v9 = vmul.f32 %v811_v6, %v811_v6  ;;  %v813_v10 = vpop.f32.mrb[45].mxu1 }
 0x215   :  { %v1036_v63 = vadd.f32 %v959_v8, %v958_v3  ;;  %1029 = vadd.xlane.f32.xlu0 %v1028_v5  ;;  %v656_v13 = vpop.f32.mrb[46].mxu0  ;;  %v893_v14 = vadd.f32 %v892_v7, %v811_v6  ;;  %v1033_v15 = vadd.f32 %v1032_v11, %v957_v62  ;;  %v961_v17 = vmul.f32 %v813_v10, %v813_v10 }
 0x216   :  { %v962_v2 = vmul.f32 %v656_v13, %v656_v13  ;;  %v658_v16 = vpop.f32.mrb[47].mxu0 }
 0x217   :  { %v817_v18 = vpop.f32.mrb[46].mxu1  ;;  %v897_v19 = vadd.f32 %v658_v16, %v656_v13  ;;  %v963_v20 = vmul.f32 %v658_v16, %v658_v16  ;;  %1034 = vadd.xlane.f32.xlu1 %v1033_v15  ;;  %v1037_v23 = vadd.f32 %v1036_v63, %v960_v9  ;;  %v894_v24 = vadd.f32 %v893_v14, %v813_v10 }
 0x218   :  { %v964_v21 = vmul.f32 %v817_v18, %v817_v18  ;;  %v819_v22 = vpop.f32.mrb[47].mxu1 }
 0x219   :  { %v1041_v26 = vadd.f32 %v963_v20, %v962_v2  ;;  %v898_v27 = vadd.f32 %v897_v19, %v817_v18  ;;  %890 = vadd.xlane.f32.xlu0 %v889_v12  ;;  %v1038_v29 = vadd.f32 %v1037_v23, %v961_v17  ;;  %v965_v31 = vmul.f32 %v819_v22, %v819_v22 }
 0x21b   :  { %v899_v30 = vadd.f32 %v898_v27, %v819_v22  ;;  %v1042_v32 = vadd.f32 %v1041_v26, %v964_v21 }
 0x21d   :  { %1039 = vadd.xlane.f32.xlu0 %v1038_v29  ;;  %v1043_v33 = vadd.f32 %v1042_v32, %v965_v31 }
 0x21f   :  { %1044 = vadd.xlane.f32.xlu1 %v1043_v33 }
 0x221   :  { %900 = vadd.xlane.f32.xlu0 %v899_v30 }
 0x223   :  { %895 = vadd.xlane.f32.xlu1 %v894_v24 }
 0x26e   :  { %v826_v34 = vpop.xlane.xlu0 %825 }
 0x270   :  { %v970_v35 = vpop.xlane.xlu1 %969 }
 0x271   :  { %v1050_v37 = vsel %vm1049_vm3, %v970_v35, 0.0 }
 0x272   :  { %v831_v38 = vpop.xlane.xlu0 %830  ;;  %v1066_v39 = vsel %vm1048_vm4, %v826_v34, %v1050_v37 }
 0x273   :  { %1082 = vst [vmem:[%s1619_s4] sm:$0xff] %v1066_v39 }
 0x276   :  { %v975_v36 = vpop.xlane.xlu0 %974  ;;  %v836_v43 = vpop.xlane.xlu1 %835 }
 0x277   :  { %v1051_v41 = vsel %vm1049_vm3, %v975_v36, 0.0 }
 0x278   :  { %v1067_v42 = vsel %vm1048_vm4, %v831_v38, %v1051_v41 }
 0x279   :  { %1083 = vst [vmem:[%s1619_s4 + $0x8] sm:$0xff] %v1067_v42 }
 0x27a   :  { %v980_v44 = vpop.xlane.xlu0 %979 }
 0x27b   :  { %v1052_v45 = vsel %vm1049_vm3, %v980_v44, 0.0 }
 0x27c   :  { %v1068_v46 = vsel %vm1048_vm4, %v836_v43, %v1052_v45  ;;  %v985_v47 = vpop.xlane.xlu1 %984 }
 0x27d   :  { %1084 = vst [vmem:[%s1619_s4 + $0x10] sm:$0xff] %v1068_v46  ;;  %v1053_v49 = vsel %vm1049_vm3, %v985_v47, 0.0 }
 0x27e   :  { %v841_v40 = vpop.xlane.xlu0 %840 }
 0x27f   :  { %v1069_v48 = vsel %vm1048_vm4, %v841_v40, %v1053_v49 }
 0x280   :  { %1085 = vst [vmem:[%s1619_s4 + $0x18] sm:$0xff] %v1069_v48  ;;  %v846_v50 = vpop.xlane.xlu1 %845 }
 0x282   :  { %v990_v51 = vpop.xlane.xlu0 %989 }
 0x283   :  { %v1054_v52 = vsel %vm1049_vm3, %v990_v51, 0.0 }
 0x284   :  { %v1070_v53 = vsel %vm1048_vm4, %v846_v50, %v1054_v52  ;;  %v995_v54 = vpop.xlane.xlu1 %994 }
 0x285   :  { %1086 = vst [vmem:[%s1619_s4 + $0x20] sm:$0xff] %v1070_v53  ;;  %v1055_v55 = vsel %vm1049_vm3, %v995_v54, 0.0 }
 0x286   :  { %v851_v56 = vpop.xlane.xlu0 %850 }
 0x287   :  { %v1071_v57 = vsel %vm1048_vm4, %v851_v56, %v1055_v55 }
 0x288   :  { %1087 = vst [vmem:[%s1619_s4 + $0x28] sm:$0xff] %v1071_v57  ;;  %v856_v58 = vpop.xlane.xlu1 %855 }
 0x28a   :  { %v1000_v59 = vpop.xlane.xlu0 %999 }
 0x28b   :  { %v1056_v60 = vsel %vm1049_vm3, %v1000_v59, 0.0 }
 0x28c   :  { %v1072_v61 = vsel %vm1048_vm4, %v856_v58, %v1056_v60  ;;  %v1005_v0 = vpop.xlane.xlu1 %1004 }
 0x28d   :  { %1088 = vst [vmem:[%s1619_s4 + $0x30] sm:$0xff] %v1072_v61  ;;  %v1057_v1 = vsel %vm1049_vm3, %v1005_v0, 0.0 }
 0x28e   :  { %v861_v3 = vpop.xlane.xlu0 %860 }
 0x28f   :  { %v1073_v62 = vsel %vm1048_vm4, %v861_v3, %v1057_v1 }
 0x290   :  { %1089 = vst [vmem:[%s1619_s4 + $0x38] sm:$0xff] %v1073_v62  ;;  %v866_v4 = vpop.xlane.xlu1 %865 }
 0x292   :  { %v1010_v5 = vpop.xlane.xlu0 %1009 }
 0x293   :  { %v1058_v6 = vsel %vm1049_vm3, %v1010_v5, 0.0 }
 0x294   :  { %v1074_v7 = vsel %vm1048_vm4, %v866_v4, %v1058_v6  ;;  %v1015_v8 = vpop.xlane.xlu1 %1014 }
 0x295   :  { %1090 = vst [vmem:[%s1619_s4 + $0x40] sm:$0xff] %v1074_v7  ;;  %v1059_v9 = vsel %vm1049_vm3, %v1015_v8, 0.0 }
 0x296   :  { %v871_v10 = vpop.xlane.xlu0 %870 }
 0x297   :  { %v1075_v11 = vsel %vm1048_vm4, %v871_v10, %v1059_v9 }
 0x298   :  { %1091 = vst [vmem:[%s1619_s4 + $0x48] sm:$0xff] %v1075_v11  ;;  %v876_v12 = vpop.xlane.xlu1 %875 }
 0x29a   :  { %v1020_v63 = vpop.xlane.xlu0 %1019 }
 0x29b   :  { %v1060_v13 = vsel %vm1049_vm3, %v1020_v63, 0.0 }
 0x29c   :  { %v1076_v14 = vsel %vm1048_vm4, %v876_v12, %v1060_v13  ;;  %v1025_v15 = vpop.xlane.xlu1 %1024 }
 0x29d   :  { %1092 = vst [vmem:[%s1619_s4 + $0x50] sm:$0xff] %v1076_v14  ;;  %v1061_v2 = vsel %vm1049_vm3, %v1025_v15, 0.0 }
 0x29e   :  { %v881_v16 = vpop.xlane.xlu0 %880 }
 0x29f   :  { %v1077_v17 = vsel %vm1048_vm4, %v881_v16, %v1061_v2 }
 0x2a0   :  { %1093 = vst [vmem:[%s1619_s4 + $0x58] sm:$0xff] %v1077_v17  ;;  %v886_v18 = vpop.xlane.xlu1 %885 }
 0x2a2   :  { %v1030_v19 = vpop.xlane.xlu0 %1029 }
 0x2a3   :  { %v1062_v20 = vsel %vm1049_vm3, %v1030_v19, 0.0 }
 0x2a4   :  { %v1078_v21 = vsel %vm1048_vm4, %v886_v18, %v1062_v20  ;;  %v1035_v22 = vpop.xlane.xlu1 %1034 }
 0x2a5   :  { %1094 = vst [vmem:[%s1619_s4 + $0x60] sm:$0xff] %v1078_v21  ;;  %v1063_v23 = vsel %vm1049_vm3, %v1035_v22, 0.0 }
 0x2a6   :  { %v891_v24 = vpop.xlane.xlu0 %890 }
 0x2a7   :  { %v1079_v26 = vsel %vm1048_vm4, %v891_v24, %v1063_v23 }
 0x2a8   :  { %1095 = vst [vmem:[%s1619_s4 + $0x68] sm:$0xff] %v1079_v26 }
 0x2aa   :  { %v1040_v27 = vpop.xlane.xlu0 %1039 }
 0x2ab   :  { %v1064_v33 = vsel %vm1049_vm3, %v1040_v27, 0.0 }
 0x2ac   :  { %v1045_v29 = vpop.xlane.xlu1 %1044 }
 0x2ad   :  { %v1065_v30 = vsel %vm1049_vm3, %v1045_v29, 0.0 }
 0x2ae   :  { %v901_v31 = vpop.xlane.xlu0 %900 }
 0x2af   :  { %v1081_v32 = vsel %vm1048_vm4, %v901_v31, %v1065_v30 }
 0x2b0   :  { %1097 = vst [vmem:[%s1619_s4 + $0x78] sm:$0xff] %v1081_v32  ;;  %v896_v25 = vpop.xlane.xlu1 %895 }
 0x2b1   :  { %v1080_v34 = vsel %vm1048_vm4, %v896_v25, %v1064_v33 }
 0x2b2   :  { %1096 = vst [vmem:[%s1619_s4 + $0x70] sm:$0xff] %v1080_v34 }

// kernel: pixel_discriminator.3
= control target key start
LH: loop header
LB: loop body
LE: loop exit
PB: predicated region body
PF: predicated region fallthrough
CT: control target
= control target key end

     0   :  { %v1716_v0 = vmov 0   ;;  %vm113_vm0 = vcmask 1043456   ;;  %v1717_v7 = vmov 0.0   ;;  %vm88_vm1 = vcmask 31744   ;;  %s2392_s2 = inlined_call_operand.vmem [shape: f32[64,1], index: 2, kind: input, shape index: {}]   ;;  %s2393_s0 = inlined_call_operand.vmem [shape: f32[4,512], index: 0, kind: input, shape index: {}]   ;;  %s2394_s1 = inlined_call_operand.vmem [shape: f32[64,4], index: 1, kind: input, shape index: {}]   ;;  %s2395_s4 = inlined_call_operand.vmem [shape: f32[128,1], index: 4, kind: input, shape index: {}]   ;;  %s2396_s5 = inlined_call_operand.vmem [shape: f32[128,1], index: 5, kind: input, shape index: {}]   ;;  %s2397_s6 = inlined_call_operand.vmem [shape: f32[128,1], index: 6, kind: input, shape index: {}]   ;;  %s2398_s3 = inlined_call_operand.vmem [shape: f32[128,64], index: 3, kind: input, shape index: {}]   ;;  %s2399_s7 = inlined_call_operand.vmem [shape: f32[1,512], index: 7, kind: output, shape index: {}]  }
   0x1   :  { %1713 = vset.pattern.permute.xlu1 %v1716_v0  ;;  %1712 = vset.pattern.permute.xlu0 %v1716_v0  ;;  %v38_v1 = vld [vmem:[%s2392_s2 + $0x10] sm:$0xff]  ;;  %v36_v2 = vld [vmem:[%s2392_s2] sm:$0xff]  ;;  %v27_v5 = vld [vmem:[%s2393_s0 + $0x8] sm:$0xff] }
   0x2   :  { %v26_v3 = vld [vmem:[%s2393_s0] sm:$0xff]  ;;  %56 = vperm.xlu1 %1713, %v38_v1   ;;  %46 = vperm.xlu0 %1712, %v36_v2   ;;  %v87_v6 = vcombine.high %v27_v5, %v27_v5  ;;  %v39_v8 = vld [vmem:[%s2392_s2 + $0x18] sm:$0xff]  ;;  %v37_v9 = vld [vmem:[%s2392_s2 + $0x8] sm:$0xff] }
   0x3   :  { %v86_v4 = vcombine.high %v26_v3, %v26_v3  ;;  %186 = vmatprep.mubr.f32.mxu0 %v1717_v7  ;;  %299 = vmatprep.mubr.f32.mxu1 %v1717_v7  ;;  %v28_v10 = vld [vmem:[%s2394_s1] sm:$0xff]  ;;  %v41_v11 = vld [vmem:[%s2392_s2 + $0x28] sm:$0xff]  ;;  %v43_v14 = vld [vmem:[%s2392_s2 + $0x38] sm:$0xff] }
   0x4   :  { %1635 = vmatprep.subr.msk.mxu1 %vm113_vm0, %v87_v6  ;;  %v40_v12 = vld [vmem:[%s2392_s2 + $0x20] sm:$0xff]  ;;  %v29_v13 = vld [vmem:[%s2394_s1 + $0x8] sm:$0xff]  ;;  %v42_v15 = vld [vmem:[%s2392_s2 + $0x30] sm:$0xff] }
   0x5   :  { %1625 = vmatprep.subr.msk.mxu0 %vm113_vm0, %v86_v4  ;;  %1636 = vmatpush1.msk.msra.mxu1 %vm113_vm0, %v27_v5  ;;  %v30_v16 = vld [vmem:[%s2394_s1 + $0x10] sm:$0xff]  ;;  %v832_v17 = vld [vmem:[%s2395_s4 + $0x8] sm:$0xff]  ;;  %v831_v18 = vld [vmem:[%s2395_s4] sm:$0xff] }
   0x6   :  { %1626 = vmatpush1.msk.msra.mxu0 %vm113_vm0, %v26_v3  ;;  %61 = vperm.xlu1 %1713, %v39_v8   ;;  %v31_v19 = vld [vmem:[%s2394_s1 + $0x18] sm:$0xff]  ;;  %v833_v21 = vld [vmem:[%s2395_s4 + $0x10] sm:$0xff]  ;;  %v32_v22 = vld [vmem:[%s2394_s1 + $0x20] sm:$0xff] }
   0x7   :  { %51 = vperm.xlu0 %1712, %v37_v9   ;;  %1627 = vmatmul.mubr.msk.f32.vlgmr.msra.gmra.mrb[0].mxu0 %vm88_vm1, %v28_v10  ;;  %v834_v20 = vld [vmem:[%s2395_s4 + $0x18] sm:$0xff]  ;;  %v836_v23 = vld [vmem:[%s2395_s4 + $0x28] sm:$0xff]  ;;  %v835_v24 = vld [vmem:[%s2395_s4 + $0x20] sm:$0xff] }
   0x8   :  { %1637 = vmatmul.mubr.msk.f32.vlgmr.msra.gmra.mrb[0].mxu1 %vm88_vm1, %v28_v10  ;;  %192 = vmatprep.mubr.f32.mxu0 %v1717_v7  ;;  %v33_v25 = vld [vmem:[%s2394_s1 + $0x28] sm:$0xff]  ;;  %v838_v26 = vld [vmem:[%s2395_s4 + $0x38] sm:$0xff]  ;;  %v837_v27 = vld [vmem:[%s2395_s4 + $0x30] sm:$0xff] }
   0x9   :  { %305 = vmatprep.mubr.f32.mxu1 %v1717_v7  ;;  %v34_v28 = vld [vmem:[%s2394_s1 + $0x30] sm:$0xff]  ;;  %v840_v29 = vld [vmem:[%s2395_s4 + $0x48] sm:$0xff]  ;;  %v839_v30 = vld [vmem:[%s2395_s4 + $0x40] sm:$0xff] }
   0xa   :  { %71 = vperm.xlu1 %1713, %v41_v11   ;;  %v35_v31 = vld [vmem:[%s2394_s1 + $0x38] sm:$0xff]  ;;  %v841_v33 = vld [vmem:[%s2395_s4 + $0x50] sm:$0xff]  ;;  %v844_v34 = vld [vmem:[%s2395_s4 + $0x68] sm:$0xff] }
   0xb   :  { %66 = vperm.xlu0 %1712, %v40_v12   ;;  %1628 = vmatmul.mubr.msk.f32.gmra.mrb[2].mxu0 %vm88_vm1, %v29_v13  ;;  %v842_v32 = vld [vmem:[%s2395_s4 + $0x58] sm:$0xff]  ;;  %v843_v35 = vld [vmem:[%s2395_s4 + $0x60] sm:$0xff]  ;;  %v845_v37 = vld [vmem:[%s2395_s4 + $0x70] sm:$0xff] }
   0xc   :  { %1638 = vmatmul.mubr.msk.f32.gmra.mrb[2].mxu1 %vm88_vm1, %v29_v13  ;;  %198 = vmatprep.mubr.f32.mxu0 %v1717_v7  ;;  %v846_v36 = vld [vmem:[%s2395_s4 + $0x78] sm:$0xff]  ;;  %v992_v38 = vld [vmem:[%s2396_s5 + $0x8] sm:$0xff]  ;;  %v991_v39 = vld [vmem:[%s2396_s5] sm:$0xff] }
   0xd   :  { %311 = vmatprep.mubr.f32.mxu1 %v1717_v7  ;;  %v994_v40 = vld [vmem:[%s2396_s5 + $0x18] sm:$0xff]  ;;  %v993_v41 = vld [vmem:[%s2396_s5 + $0x10] sm:$0xff]  ;;  %v1344_v42 = vld [vmem:[%s2397_s6 + $0x8] sm:$0xff] }
   0xe   :  { %81 = vperm.xlu1 %1713, %v43_v14   ;;  %v1343_v43 = vld [vmem:[%s2397_s6] sm:$0xff]  ;;  %v1345_v44 = vld [vmem:[%s2397_s6 + $0x10] sm:$0xff]  ;;  %v1346_v46 = vld [vmem:[%s2397_s6 + $0x18] sm:$0xff] }
   0xf   :  { %76 = vperm.xlu0 %1712, %v42_v15   ;;  %1629 = vmatmul.mubr.msk.f32.gmra.mrb[4].mxu0 %vm88_vm1, %v30_v16  ;;  %v995_v45 = vld [vmem:[%s2396_s5 + $0x20] sm:$0xff]  ;;  %v996_v47 = vld [vmem:[%s2396_s5 + $0x28] sm:$0xff]  ;;  %v997_v49 = vld [vmem:[%s2396_s5 + $0x30] sm:$0xff] }
  0x10   :  { %1639 = vmatmul.mubr.msk.f32.gmra.mrb[4].mxu1 %vm88_vm1, %v30_v16  ;;  %204 = vmatprep.mubr.f32.mxu0 %v1717_v7  ;;  %v1347_v48 = vld [vmem:[%s2397_s6 + $0x20] sm:$0xff]  ;;  %v1348_v50 = vld [vmem:[%s2397_s6 + $0x28] sm:$0xff]  ;;  %v998_v51 = vld [vmem:[%s2396_s5 + $0x38] sm:$0xff] }
  0x11   :  { %317 = vmatprep.mubr.f32.mxu1 %v1717_v7  ;;  %v1349_v52 = vld [vmem:[%s2397_s6 + $0x30] sm:$0xff]  ;;  %v999_v53 = vld [vmem:[%s2396_s5 + $0x40] sm:$0xff]  ;;  %v1350_v54 = vld [vmem:[%s2397_s6 + $0x38] sm:$0xff] }
  0x12   :  { %854 = vperm.xlu1 %1713, %v832_v17   ;;  %v1000_v55 = vld [vmem:[%s2396_s5 + $0x48] sm:$0xff]  ;;  %v1351_v56 = vld [vmem:[%s2397_s6 + $0x40] sm:$0xff]  ;;  %v1001_v57 = vld [vmem:[%s2396_s5 + $0x50] sm:$0xff] }
  0x13   :  { %849 = vperm.xlu0 %1712, %v831_v18   ;;  %1630 = vmatmul.mubr.msk.f32.gmra.mrb[6].mxu0 %vm88_vm1, %v31_v19  ;;  %v1352_v58 = vld [vmem:[%s2397_s6 + $0x48] sm:$0xff]  ;;  %v1002_v59 = vld [vmem:[%s2396_s5 + $0x58] sm:$0xff]  ;;  %v1353_v60 = vld [vmem:[%s2397_s6 + $0x50] sm:$0xff] }
  0x14   :  { %1640 = vmatmul.mubr.msk.f32.gmra.mrb[6].mxu1 %vm88_vm1, %v31_v19  ;;  %210 = vmatprep.mubr.f32.mxu0 %v1717_v7  ;;  %v1003_v61 = vld [vmem:[%s2396_s5 + $0x60] sm:$0xff]  ;;  %v1354_v62 = vld [vmem:[%s2397_s6 + $0x58] sm:$0xff]  ;;  %v1004_v63 = vld [vmem:[%s2396_s5 + $0x68] sm:$0xff] }
  0x15   :  { %323 = vmatprep.mubr.f32.mxu1 %v1717_v7  ;;  %v1355_v0 = vld [vmem:[%s2397_s6 + $0x60] sm:$0xff]  ;;  %v1005_v1 = vld [vmem:[%s2396_s5 + $0x70] sm:$0xff]  ;;  %v1356_v2 = vld [vmem:[%s2397_s6 + $0x68] sm:$0xff] }
  0x16   :  { %864 = vperm.xlu1 %1713, %v834_v20   ;;  %v1006_v3 = vld [vmem:[%s2396_s5 + $0x78] sm:$0xff]  ;;  %v1357_v5 = vld [vmem:[%s2397_s6 + $0x70] sm:$0xff] }
  0x17   :  { %859 = vperm.xlu0 %1712, %v833_v21   ;;  %1631 = vmatmul.mubr.msk.f32.gmra.mrb[8].mxu0 %vm88_vm1, %v32_v22  ;;  %v1358_v4 = vld [vmem:[%s2397_s6 + $0x78] sm:$0xff] }
  0x18   :  { %1641 = vmatmul.mubr.msk.f32.gmra.mrb[8].mxu1 %vm88_vm1, %v32_v22  ;;  %216 = vmatprep.mubr.f32.mxu0 %v1717_v7 }
  0x19   :  { %329 = vmatprep.mubr.f32.mxu1 %v1717_v7 }
  0x1a   :  { %874 = vperm.xlu1 %1713, %v836_v23  }
  0x1b   :  { %869 = vperm.xlu0 %1712, %v835_v24   ;;  %1632 = vmatmul.mubr.msk.f32.gmra.mrb[10].mxu0 %vm88_vm1, %v33_v25 }
  0x1c   :  { %1642 = vmatmul.mubr.msk.f32.gmra.mrb[10].mxu1 %vm88_vm1, %v33_v25  ;;  %222 = vmatprep.mubr.f32.mxu0 %v1717_v7 }
  0x1d   :  { %335 = vmatprep.mubr.f32.mxu1 %v1717_v7 }
  0x1e   :  { %884 = vperm.xlu1 %1713, %v838_v26  }
  0x1f   :  { %879 = vperm.xlu0 %1712, %v837_v27   ;;  %1633 = vmatmul.mubr.msk.f32.gmra.mrb[12].mxu0 %vm88_vm1, %v34_v28 }
  0x20   :  { %1643 = vmatmul.mubr.msk.f32.gmra.mrb[12].mxu1 %vm88_vm1, %v34_v28  ;;  %228 = vmatprep.mubr.f32.mxu0 %v1717_v7 }
  0x21   :  { %341 = vmatprep.mubr.f32.mxu1 %v1717_v7 }
  0x22   :  { %894 = vperm.xlu1 %1713, %v840_v29  }
  0x23   :  { %889 = vperm.xlu0 %1712, %v839_v30   ;;  %1634 = vmatmul.mubr.msk.f32.gmra.mrb[14].mxu0 %vm88_vm1, %v35_v31 }
  0x24   :  { %1644 = vmatmul.mubr.msk.f32.gmra.mrb[14].mxu1 %vm88_vm1, %v35_v31  ;;  %573 = vmatprep.mubr.f32.mxu0 %v1717_v7 }
  0x25   :  { %734 = vmatprep.mubr.f32.mxu1 %v1717_v7 }
  0x26   :  { %904 = vperm.xlu1 %1713, %v842_v32  }
  0x27   :  { %899 = vperm.xlu0 %1712, %v841_v33  }
  0x2a   :  { %914 = vperm.xlu1 %1713, %v844_v34  }
  0x2b   :  { %909 = vperm.xlu0 %1712, %v843_v35  }
  0x2e   :  { %924 = vperm.xlu1 %1713, %v846_v36  }
  0x2f   :  { %919 = vperm.xlu0 %1712, %v845_v37  }
  0x32   :  { %1014 = vperm.xlu1 %1713, %v992_v38  }
  0x33   :  { %1009 = vperm.xlu0 %1712, %v991_v39  }
  0x36   :  { %1024 = vperm.xlu1 %1713, %v994_v40  }
  0x37   :  { %1019 = vperm.xlu0 %1712, %v993_v41  }
  0x3a   :  { %1366 = vperm.xlu1 %1713, %v1344_v42  }
  0x3b   :  { %1361 = vperm.xlu0 %1712, %v1343_v43  }
  0x3e   :  { %1371 = vperm.xlu1 %1713, %v1345_v44  }
  0x3f   :  { %1029 = vperm.xlu0 %1712, %v995_v45  }
  0x42   :  { %1376 = vperm.xlu1 %1713, %v1346_v46  }
  0x43   :  { %1034 = vperm.xlu0 %1712, %v996_v47  }
  0x46   :  { %1381 = vperm.xlu1 %1713, %v1347_v48  }
  0x47   :  { %1039 = vperm.xlu0 %1712, %v997_v49  }
  0x4a   :  { %1386 = vperm.xlu1 %1713, %v1348_v50  }
  0x4b   :  { %1044 = vperm.xlu0 %1712, %v998_v51  }
  0x4e   :  { %1391 = vperm.xlu1 %1713, %v1349_v52  }
  0x4f   :  { %1049 = vperm.xlu0 %1712, %v999_v53  }
  0x52   :  { %1396 = vperm.xlu1 %1713, %v1350_v54  }
  0x53   :  { %1054 = vperm.xlu0 %1712, %v1000_v55  }
  0x56   :  { %1401 = vperm.xlu1 %1713, %v1351_v56  }
  0x57   :  { %1059 = vperm.xlu0 %1712, %v1001_v57  }
  0x5a   :  { %1406 = vperm.xlu1 %1713, %v1352_v58  }
  0x5b   :  { %1064 = vperm.xlu0 %1712, %v1002_v59  }
  0x5e   :  { %1411 = vperm.xlu1 %1713, %v1353_v60  }
  0x5f   :  { %1069 = vperm.xlu0 %1712, %v1003_v61  }
  0x62   :  { %1416 = vperm.xlu1 %1713, %v1354_v62  }
  0x63   :  { %1074 = vperm.xlu0 %1712, %v1004_v63  }
  0x66   :  { %1421 = vperm.xlu1 %1713, %v1355_v0  }
  0x67   :  { %1079 = vperm.xlu0 %1712, %v1005_v1  }
  0x6a   :  { %1426 = vperm.xlu1 %1713, %v1356_v2  }
  0x6b   :  { %1084 = vperm.xlu0 %1712, %v1006_v3  }
  0x6e   :  { %1436 = vperm.xlu1 %1713, %v1358_v4  }
  0x6f   :  { %1431 = vperm.xlu0 %1712, %v1357_v5  }
  0x81   :  { %v47_v6 = vpop.permute.xlu0 %46  ;;  %v57_v29 = vpop.permute.xlu1 %56 }
  0x85   :  { %v62_v52 = vpop.permute.xlu1 %61 }
  0x86   :  { %v52_v17 = vpop.permute.xlu0 %51 }
  0xda   :  { %v188_v8 = vpop.f32.mrb[0].mxu0 }
  0xdb   :  { %v189_v9 = vadd.f32 %v188_v8, %v47_v6  ;;  %v301_v10 = vpop.f32.mrb[0].mxu1  ;;  %v190_v11 = vpop.f32.mrb[1].mxu0 }
  0xdc   :  { %v302_v12 = vadd.f32 %v301_v10, %v47_v6  ;;  %v191_v13 = vadd.f32 %v190_v11, %v47_v6  ;;  %v303_v14 = vpop.f32.mrb[1].mxu1  ;;  %v67_v8 = vpop.permute.xlu0 %66 }
  0xdd   :  { %v380_v15 = vmul.f32 0.2, %v189_v9  ;;  %v304_v16 = vadd.f32 %v303_v14, %v47_v6  ;;  %vm348_vm2 = vcmp.gt.f32.partialorder %v189_v9, 0.0 }
  0xde   :  { %vm350_vm3 = vcmp.gt.f32.partialorder %v302_v12, 0.0  ;;  %v382_v18 = vmul.f32 0.2, %v302_v12  ;;  %v194_v19 = vpop.f32.mrb[2].mxu0  ;;  %vm349_vm4 = vcmp.gt.f32.partialorder %v191_v13, 0.0 }
  0xdf   :  { %v307_v20 = vpop.f32.mrb[2].mxu1  ;;  %v381_v21 = vmul.f32 0.2, %v191_v13  ;;  %v195_v22 = vadd.f32 %v194_v19, %v52_v17  ;;  %v196_v24 = vpop.f32.mrb[3].mxu0  ;;  %v412_v26 = vsel %vm348_vm2, %v189_v9, %v380_v15  ;;  %vm351_vm5 = vcmp.gt.f32.partialorder %v304_v16, 0.0 }
  0xe0   :  { %v308_v23 = vadd.f32 %v307_v20, %v52_v17  ;;  %v309_v25 = vpop.f32.mrb[3].mxu1  ;;  %v197_v27 = vadd.f32 %v196_v24, %v52_v17  ;;  %v414_v34 = vsel %vm350_vm3, %v302_v12, %v382_v18  ;;  %v383_v35 = vmul.f32 0.2, %v304_v16 }
  0xe1   :  { %v310_v28 = vadd.f32 %v309_v25, %v52_v17  ;;  %vm352_vm6 = vcmp.gt.f32.partialorder %v195_v22, 0.0  ;;  %v384_v30 = vmul.f32 0.2, %v195_v22  ;;  %v413_v53 = vsel %vm349_vm4, %v191_v13, %v381_v21 }
  0xe2   :  { %vm354_vm7 = vcmp.gt.f32.partialorder %v308_v23, 0.0  ;;  %v386_v31 = vmul.f32 0.2, %v308_v23  ;;  %vm353_vm8 = vcmp.gt.f32.partialorder %v197_v27, 0.0  ;;  %v385_v32 = vmul.f32 0.2, %v197_v27 }
  0xe3   :  { %vm355_vm9 = vcmp.gt.f32.partialorder %v310_v28, 0.0  ;;  %v387_v33 = vmul.f32 0.2, %v310_v28  ;;  %v416_v36 = vsel %vm352_vm6, %v195_v22, %v384_v30  ;;  %v200_v38 = vpop.f32.mrb[4].mxu0  ;;  %v313_v39 = vpop.f32.mrb[4].mxu1  ;;  %v415_v54 = vsel %vm351_vm5, %v304_v16, %v383_v35 }
  0xe4   :  { %v418_v37 = vsel %vm354_vm7, %v308_v23, %v386_v31  ;;  %v1679_v40 = vpack.c.bf16 %v416_v36, %v412_v26  ;;  %v201_v42 = vadd.f32 %v200_v38, %v57_v29  ;;  %v314_v43 = vadd.f32 %v313_v39, %v57_v29  ;;  %v202_v44 = vpop.f32.mrb[5].mxu0  ;;  %v315_v45 = vpop.f32.mrb[5].mxu1 }
  0xe5   :  { %v1695_v41 = vpack.c.bf16 %v418_v37, %v414_v34  ;;  %v203_v46 = vadd.f32 %v202_v44, %v57_v29  ;;  %v316_v47 = vadd.f32 %v315_v45, %v57_v29  ;;  %v417_v48 = vsel %vm353_vm8, %v197_v27, %v385_v32  ;;  %v72_v29 = vpop.permute.xlu1 %71 }
  0xe6   :  { %v419_v49 = vsel %vm355_vm9, %v310_v28, %v387_v33  ;;  %vm356_vm10 = vcmp.gt.f32.partialorder %v201_v42, 0.0  ;;  %v388_v50 = vmul.f32 0.2, %v201_v42  ;;  %v390_v51 = vmul.f32 0.2, %v314_v43  ;;  %v206_v56 = vpop.f32.mrb[6].mxu0 }
  0xe7   :  { %vm358_vm11 = vcmp.gt.f32.partialorder %v314_v43, 0.0  ;;  %vm357_vm12 = vcmp.gt.f32.partialorder %v203_v46, 0.0  ;;  %v389_v55 = vmul.f32 0.2, %v203_v46  ;;  %v319_v57 = vpop.f32.mrb[6].mxu1  ;;  %v1677_v58 = vpack.c.bf16 %v417_v48, %v413_v53  ;;  %v208_v0 = vpop.f32.mrb[7].mxu0 }
  0xe8   :  { %v1693_v59 = vpack.c.bf16 %v419_v49, %v415_v54  ;;  %v2000_v60 = vsel %vm356_vm10, %v201_v42, %v388_v50  ;;  %v391_v61 = vmul.f32 0.2, %v316_v47  ;;  %v207_v62 = vadd.f32 %v206_v56, %v62_v52  ;;  %v321_v1 = vpop.f32.mrb[7].mxu1  ;;  %v77_v50 = vpop.permute.xlu0 %76 }
  0xe9   :  { %v320_v63 = vadd.f32 %v319_v57, %v62_v52  ;;  %v2002_v2 = vsel %vm358_vm11, %v314_v43, %v390_v51  ;;  %vm359_vm13 = vcmp.gt.f32.partialorder %v316_v47, 0.0  ;;  %v209_v3 = vadd.f32 %v208_v0, %v62_v52  ;;  %1678 = vmatprep.subr.bf16.mxu0 %v1677_v58 }
  0xea   :  { %v322_v4 = vadd.f32 %v321_v1, %v62_v52  ;;  %1694 = vmatprep.subr.bf16.mxu1 %v1693_v59  ;;  %vm360_vm14 = vcmp.gt.f32.partialorder %v207_v62, 0.0  ;;  %v392_v5 = vmul.f32 0.2, %v207_v62  ;;  %1680 = vmatpush1.bf16.msra.mxu0 %v1679_v40  ;;  %v212_v13 = vpop.f32.mrb[8].mxu0  ;;  %v421_v15 = vsel %vm357_vm12, %v203_v46, %v389_v55 }
  0xeb   :  { %vm362_vm15 = vcmp.gt.f32.partialorder %v320_v63, 0.0  ;;  %v394_v6 = vmul.f32 0.2, %v320_v63  ;;  %1696 = vmatpush1.bf16.msra.mxu1 %v1695_v41  ;;  %vm361_vm0 = vcmp.gt.f32.partialorder %v209_v3, 0.0  ;;  %v393_v9 = vmul.f32 0.2, %v209_v3 }
  0xec   :  { %vm363_vm1 = vcmp.gt.f32.partialorder %v322_v4, 0.0  ;;  %v395_v10 = vmul.f32 0.2, %v322_v4  ;;  %v424_v11 = vsel %vm360_vm14, %v207_v62, %v392_v5  ;;  %v325_v14 = vpop.f32.mrb[8].mxu1  ;;  %v423_v16 = vsel %vm359_vm13, %v316_v47, %v391_v61  ;;  %v214_v21 = vpop.f32.mrb[9].mxu0 }
  0xed   :  { %v426_v12 = vsel %vm362_vm15, %v320_v63, %v394_v6  ;;  %v1683_v17 = vpack.c.bf16 %v424_v11, %v2000_v60  ;;  %v213_v19 = vadd.f32 %v212_v13, %v67_v8  ;;  %v326_v20 = vadd.f32 %v325_v14, %v67_v8  ;;  %v327_v22 = vpop.f32.mrb[9].mxu1 }
  0xee   :  { %v1699_v18 = vpack.c.bf16 %v426_v12, %v2002_v2  ;;  %v215_v23 = vadd.f32 %v214_v21, %v67_v8  ;;  %v328_v24 = vadd.f32 %v327_v22, %v67_v8  ;;  %v425_v25 = vsel %vm361_vm0, %v209_v3, %v393_v9  ;;  %v218_v33 = vpop.f32.mrb[10].mxu0  ;;  %v82_v3 = vpop.permute.xlu1 %81 }
  0xef   :  { %v427_v26 = vsel %vm363_vm1, %v322_v4, %v395_v10  ;;  %vm364_vm2 = vcmp.gt.f32.partialorder %v213_v19, 0.0  ;;  %v396_v27 = vmul.f32 0.2, %v213_v19  ;;  %vm366_vm3 = vcmp.gt.f32.partialorder %v326_v20, 0.0  ;;  %v331_v34 = vpop.f32.mrb[10].mxu1  ;;  %v220_v40 = vpop.f32.mrb[11].mxu0 }
  0xf0   :  { %v398_v28 = vmul.f32 0.2, %v326_v20  ;;  %vm365_vm4 = vcmp.gt.f32.partialorder %v215_v23, 0.0  ;;  %v397_v30 = vmul.f32 0.2, %v215_v23  ;;  %vm367_vm5 = vcmp.gt.f32.partialorder %v328_v24, 0.0 }
  0xf1   :  { %v399_v31 = vmul.f32 0.2, %v328_v24  ;;  %v2010_v32 = vsel %vm364_vm2, %v213_v19, %v396_v27  ;;  %v1681_v35 = vpack.c.bf16 %v425_v25, %v421_v15  ;;  %v1697_v36 = vpack.c.bf16 %v427_v26, %v423_v16  ;;  %v333_v41 = vpop.f32.mrb[11].mxu1 }
  0xf2   :  { %v2012_v37 = vsel %vm366_vm3, %v326_v20, %v398_v28  ;;  %v219_v38 = vadd.f32 %v218_v33, %v72_v29  ;;  %v332_v39 = vadd.f32 %v331_v34, %v72_v29  ;;  %v2014_v42 = vsel %vm365_vm4, %v215_v23, %v397_v30  ;;  %v224_v45 = vpop.f32.mrb[12].mxu0  ;;  %v444_v33 = vld [vmem:[%s2398_s3] sm:$0xff]  ;;  %v445_v34 = vld [vmem:[%s2398_s3 + $0x8] sm:$0xff] }
  0xf3   :  { %v221_v43 = vadd.f32 %v220_v40, %v72_v29  ;;  %v334_v44 = vadd.f32 %v333_v41, %v72_v29  ;;  %1682 = vmatprep.subr.bf16.mxu0 %v1681_v35  ;;  %1698 = vmatprep.subr.bf16.mxu1 %v1697_v36  ;;  %v337_v46 = vpop.f32.mrb[12].mxu1  ;;  %v431_v47 = vsel %vm367_vm5, %v328_v24, %v399_v31  ;;  %v226_v57 = vpop.f32.mrb[13].mxu0  ;;  %vm460_vm2 = vcmask 523264   ;;  %v446_v35 = vld [vmem:[%s2398_s3 + $0x10] sm:$0xff]  ;;  %v447_v36 = vld [vmem:[%s2398_s3 + $0x18] sm:$0xff]  ;;  %v452_v41 = vld [vmem:[%s2398_s3 + $0x40] sm:$0xff] }
  0xf4   :  { %vm368_vm6 = vcmp.gt.f32.partialorder %v219_v38, 0.0  ;;  %v400_v48 = vmul.f32 0.2, %v219_v38  ;;  %vm370_vm7 = vcmp.gt.f32.partialorder %v332_v39, 0.0  ;;  %v402_v49 = vmul.f32 0.2, %v332_v39  ;;  %1684 = vmatpush1.bf16.msra.mxu0 %v1683_v17  ;;  %1700 = vmatpush1.bf16.msra.mxu1 %v1699_v18 }
  0xf5   :  { %vm369_vm8 = vcmp.gt.f32.partialorder %v221_v43, 0.0  ;;  %v401_v51 = vmul.f32 0.2, %v221_v43  ;;  %vm371_vm9 = vcmp.gt.f32.partialorder %v334_v44, 0.0  ;;  %v403_v52 = vmul.f32 0.2, %v334_v44 }
  0xf6   :  { %v432_v53 = vsel %vm368_vm6, %v219_v38, %v400_v48  ;;  %v434_v54 = vsel %vm370_vm7, %v332_v39, %v402_v49  ;;  %v225_v55 = vadd.f32 %v224_v45, %v77_v50  ;;  %v338_v56 = vadd.f32 %v337_v46, %v77_v50  ;;  %v339_v58 = vpop.f32.mrb[13].mxu1  ;;  %v230_v63 = vpop.f32.mrb[14].mxu0  ;;  %v449_v38 = vld [vmem:[%s2398_s3 + $0x28] sm:$0xff]  ;;  %v450_v39 = vld [vmem:[%s2398_s3 + $0x30] sm:$0xff]  ;;  %v451_v40 = vld [vmem:[%s2398_s3 + $0x38] sm:$0xff] }
  0xf7   :  { %v1687_v59 = vpack.c.bf16 %v432_v53, %v2010_v32  ;;  %v1703_v60 = vpack.c.bf16 %v434_v54, %v2012_v37  ;;  %v227_v61 = vadd.f32 %v226_v57, %v77_v50  ;;  %v340_v62 = vadd.f32 %v339_v58, %v77_v50  ;;  %v343_v0 = vpop.f32.mrb[14].mxu1  ;;  %v232_v11 = vpop.f32.mrb[15].mxu0  ;;  %v448_v37 = vld [vmem:[%s2398_s3 + $0x20] sm:$0xff]  ;;  %v457_v46 = vld [vmem:[%s2398_s3 + $0x68] sm:$0xff]  ;;  %v459_v48 = vld [vmem:[%s2398_s3 + $0x78] sm:$0xff] }
  0xf8   :  { %vm372_vm10 = vcmp.gt.f32.partialorder %v225_v55, 0.0  ;;  %v404_v1 = vmul.f32 0.2, %v225_v55  ;;  %vm374_vm11 = vcmp.gt.f32.partialorder %v338_v56, 0.0  ;;  %v406_v2 = vmul.f32 0.2, %v338_v56  ;;  %v2134_v49 = vpop.permute.xlu1 %854  ;;  %v850_v50 = vpop.permute.xlu0 %849 }
  0xf9   :  { %vm373_vm12 = vcmp.gt.f32.partialorder %v227_v61, 0.0  ;;  %v405_v4 = vmul.f32 0.2, %v227_v61  ;;  %vm375_vm13 = vcmp.gt.f32.partialorder %v340_v62, 0.0  ;;  %v407_v5 = vmul.f32 0.2, %v340_v62 }
  0xfa   :  { %v436_v6 = vsel %vm372_vm10, %v225_v55, %v404_v1  ;;  %v438_v8 = vsel %vm374_vm11, %v338_v56, %v406_v2  ;;  %v231_v9 = vadd.f32 %v230_v63, %v82_v3  ;;  %v344_v10 = vadd.f32 %v343_v0, %v82_v3  ;;  %v345_v12 = vpop.f32.mrb[15].mxu1  ;;  %v456_v45 = vld [vmem:[%s2398_s3 + $0x60] sm:$0xff] }
  0xfb   :  { %v233_v13 = vadd.f32 %v232_v11, %v82_v3  ;;  %v346_v14 = vadd.f32 %v345_v12, %v82_v3  ;;  %v433_v15 = vsel %vm369_vm8, %v221_v43, %v401_v51  ;;  %v435_v16 = vsel %vm371_vm9, %v334_v44, %v403_v52  ;;  %v454_v43 = vld [vmem:[%s2398_s3 + $0x50] sm:$0xff]  ;;  %v455_v44 = vld [vmem:[%s2398_s3 + $0x58] sm:$0xff] }
  0xfc   :  { %vm376_vm14 = vcmp.gt.f32.partialorder %v231_v9, 0.0  ;;  %v408_v17 = vmul.f32 0.2, %v231_v9  ;;  %vm378_vm15 = vcmp.gt.f32.partialorder %v344_v10, 0.0  ;;  %v410_v18 = vmul.f32 0.2, %v344_v10  ;;  %v2136_v51 = vpop.permute.xlu1 %864  ;;  %v2138_v52 = vpop.permute.xlu0 %859 }
  0xfd   :  { %vm377_vm0 = vcmp.gt.f32.partialorder %v233_v13, 0.0  ;;  %v409_v19 = vmul.f32 0.2, %v233_v13  ;;  %vm379_vm1 = vcmp.gt.f32.partialorder %v346_v14, 0.0  ;;  %v411_v20 = vmul.f32 0.2, %v346_v14 }
  0xfe   :  { %v440_v21 = vsel %vm376_vm14, %v231_v9, %v408_v17  ;;  %v442_v22 = vsel %vm378_vm15, %v344_v10, %v410_v18  ;;  %v1685_v23 = vpack.c.bf16 %v433_v15, %v2014_v42  ;;  %v1701_v24 = vpack.c.bf16 %v435_v16, %v431_v47  ;;  %v453_v42 = vld [vmem:[%s2398_s3 + $0x48] sm:$0xff]  ;;  %v458_v47 = vld [vmem:[%s2398_s3 + $0x70] sm:$0xff] }
  0xff   :  { %v1691_v25 = vpack.c.bf16 %v440_v21, %v436_v6  ;;  %v1707_v26 = vpack.c.bf16 %v442_v22, %v438_v8  ;;  %v437_v27 = vsel %vm373_vm12, %v227_v61, %v405_v4  ;;  %v441_v28 = vsel %vm377_vm0, %v233_v13, %v409_v19 }
 0x100   :  { %1686 = vmatprep.subr.bf16.mxu0 %v1685_v23  ;;  %1702 = vmatprep.subr.bf16.mxu1 %v1701_v24  ;;  %v1689_v29 = vpack.c.bf16 %v441_v28, %v437_v27  ;;  %v439_v30 = vsel %vm375_vm13, %v340_v62, %v407_v5  ;;  %v443_v31 = vsel %vm379_vm1, %v346_v14, %v411_v20  ;;  %v2140_v53 = vpop.permute.xlu1 %874  ;;  %v2142_v54 = vpop.permute.xlu0 %869 }
 0x101   :  { %1688 = vmatpush1.bf16.msra.mxu0 %v1687_v59  ;;  %1704 = vmatpush1.bf16.msra.mxu1 %v1703_v60  ;;  %v1705_v32 = vpack.c.bf16 %v443_v31, %v439_v30 }
 0x102   :  { %1690 = vmatprep.subr.bf16.mxu0 %v1689_v29 }
 0x103   :  { %1706 = vmatprep.subr.bf16.mxu1 %v1705_v32 }
 0x104   :  { %v2146_v55 = vpop.permute.xlu0 %879 }
 0x105   :  { %1692 = vmatpush1.bf16.msra.mxu0 %v1691_v25  ;;  %1708 = vmatpush1.bf16.msra.mxu1 %v1707_v26 }
 0x108   :  { %1645 = vmatmul.mubr.msk.f32.vlgmr.msra.gmra.mrb[16].mxu0 %vm460_vm2, %v444_v33  ;;  %1661 = vmatmul.mubr.msk.f32.vlgmr.msra.gmra.mrb[16].mxu1 %vm460_vm2, %v444_v33  ;;  %v2150_v57 = vpop.permute.xlu0 %889 }
 0x109   :  { %579 = vmatprep.mubr.f32.mxu0 %v1717_v7  ;;  %740 = vmatprep.mubr.f32.mxu1 %v1717_v7 }
 0x10c   :  { %1646 = vmatmul.mubr.msk.f32.gmra.mrb[18].mxu0 %vm460_vm2, %v445_v34  ;;  %1662 = vmatmul.mubr.msk.f32.gmra.mrb[18].mxu1 %vm460_vm2, %v445_v34  ;;  %v2154_v59 = vpop.permute.xlu0 %899 }
 0x10d   :  { %585 = vmatprep.mubr.f32.mxu0 %v1717_v7  ;;  %746 = vmatprep.mubr.f32.mxu1 %v1717_v7 }
 0x110   :  { %1647 = vmatmul.mubr.msk.f32.gmra.mrb[20].mxu0 %vm460_vm2, %v446_v35  ;;  %1663 = vmatmul.mubr.msk.f32.gmra.mrb[20].mxu1 %vm460_vm2, %v446_v35  ;;  %v2158_v61 = vpop.permute.xlu0 %909 }
 0x111   :  { %591 = vmatprep.mubr.f32.mxu0 %v1717_v7  ;;  %752 = vmatprep.mubr.f32.mxu1 %v1717_v7 }
 0x114   :  { %1648 = vmatmul.mubr.msk.f32.gmra.mrb[22].mxu0 %vm460_vm2, %v447_v36  ;;  %1664 = vmatmul.mubr.msk.f32.gmra.mrb[22].mxu1 %vm460_vm2, %v447_v36  ;;  %v2162_v63 = vpop.permute.xlu0 %919 }
 0x115   :  { %597 = vmatprep.mubr.f32.mxu0 %v1717_v7  ;;  %758 = vmatprep.mubr.f32.mxu1 %v1717_v7 }
 0x118   :  { %1649 = vmatmul.mubr.msk.f32.gmra.mrb[24].mxu0 %vm460_vm2, %v448_v37  ;;  %1665 = vmatmul.mubr.msk.f32.gmra.mrb[24].mxu1 %vm460_vm2, %v448_v37  ;;  %v1010_v1 = vpop.permute.xlu0 %1009 }
 0x119   :  { %603 = vmatprep.mubr.f32.mxu0 %v1717_v7  ;;  %764 = vmatprep.mubr.f32.mxu1 %v1717_v7 }
 0x11c   :  { %1650 = vmatmul.mubr.msk.f32.gmra.mrb[26].mxu0 %vm460_vm2, %v449_v38  ;;  %1666 = vmatmul.mubr.msk.f32.gmra.mrb[26].mxu1 %vm460_vm2, %v449_v38  ;;  %v2166_v3 = vpop.permute.xlu0 %1019 }
 0x11d   :  { %609 = vmatprep.mubr.f32.mxu0 %v1717_v7  ;;  %770 = vmatprep.mubr.f32.mxu1 %v1717_v7 }
 0x120   :  { %1651 = vmatmul.mubr.msk.f32.gmra.mrb[28].mxu0 %vm460_vm2, %v450_v39  ;;  %1667 = vmatmul.mubr.msk.f32.gmra.mrb[28].mxu1 %vm460_vm2, %v450_v39  ;;  %v1362_v22 = vpop.permute.xlu0 %1361 }
 0x121   :  { %615 = vmatprep.mubr.f32.mxu0 %v1717_v7  ;;  %776 = vmatprep.mubr.f32.mxu1 %v1717_v7 }
 0x124   :  { %1652 = vmatmul.mubr.msk.f32.gmra.mrb[30].mxu0 %vm460_vm2, %v451_v40  ;;  %1668 = vmatmul.mubr.msk.f32.gmra.mrb[30].mxu1 %vm460_vm2, %v451_v40 }
 0x125   :  { %621 = vmatprep.mubr.f32.mxu0 %v1717_v7  ;;  %782 = vmatprep.mubr.f32.mxu1 %v1717_v7 }
 0x128   :  { %1653 = vmatmul.mubr.msk.f32.gmra.mrb[32].mxu0 %vm460_vm2, %v452_v41  ;;  %1669 = vmatmul.mubr.msk.f32.gmra.mrb[32].mxu1 %vm460_vm2, %v452_v41 }
 0x129   :  { %627 = vmatprep.mubr.f32.mxu0 %v1717_v7  ;;  %788 = vmatprep.mubr.f32.mxu1 %v1717_v7 }
 0x12c   :  { %1654 = vmatmul.mubr.msk.f32.gmra.mrb[34].mxu0 %vm460_vm2, %v453_v42  ;;  %1670 = vmatmul.mubr.msk.f32.gmra.mrb[34].mxu1 %vm460_vm2, %v453_v42 }
 0x12d   :  { %633 = vmatprep.mubr.f32.mxu0 %v1717_v7  ;;  %794 = vmatprep.mubr.f32.mxu1 %v1717_v7 }
 0x130   :  { %1655 = vmatmul.mubr.msk.f32.gmra.mrb[36].mxu0 %vm460_vm2, %v454_v43  ;;  %1671 = vmatmul.mubr.msk.f32.gmra.mrb[36].mxu1 %vm460_vm2, %v454_v43 }
 0x131   :  { %639 = vmatprep.mubr.f32.mxu0 %v1717_v7  ;;  %800 = vmatprep.mubr.f32.mxu1 %v1717_v7 }
 0x134   :  { %1656 = vmatmul.mubr.msk.f32.gmra.mrb[38].mxu0 %vm460_vm2, %v455_v44  ;;  %1672 = vmatmul.mubr.msk.f32.gmra.mrb[38].mxu1 %vm460_vm2, %v455_v44 }
 0x135   :  { %645 = vmatprep.mubr.f32.mxu0 %v1717_v7  ;;  %806 = vmatprep.mubr.f32.mxu1 %v1717_v7 }
 0x138   :  { %1657 = vmatmul.mubr.msk.f32.gmra.mrb[40].mxu0 %vm460_vm2, %v456_v45  ;;  %1673 = vmatmul.mubr.msk.f32.gmra.mrb[40].mxu1 %vm460_vm2, %v456_v45 }
 0x139   :  { %651 = vmatprep.mubr.f32.mxu0 %v1717_v7  ;;  %812 = vmatprep.mubr.f32.mxu1 %v1717_v7 }
 0x13c   :  { %1658 = vmatmul.mubr.msk.f32.gmra.mrb[42].mxu0 %vm460_vm2, %v457_v46  ;;  %1674 = vmatmul.mubr.msk.f32.gmra.mrb[42].mxu1 %vm460_vm2, %v457_v46 }
 0x13d   :  { %657 = vmatprep.mubr.f32.mxu0 %v1717_v7  ;;  %818 = vmatprep.mubr.f32.mxu1 %v1717_v7 }
 0x140   :  { %1659 = vmatmul.mubr.msk.f32.gmra.mrb[44].mxu0 %vm460_vm2, %v458_v47  ;;  %1675 = vmatmul.mubr.msk.f32.gmra.mrb[44].mxu1 %vm460_vm2, %v458_v47 }
 0x141   :  { %663 = vmatprep.mubr.f32.mxu0 %v1717_v7  ;;  %824 = vmatprep.mubr.f32.mxu1 %v1717_v7  ;;  %v2144_v7 = vpop.permute.xlu1 %884 }
 0x144   :  { %1660 = vmatmul.mubr.msk.f32.gmra.mrb[46].mxu0 %vm460_vm2, %v459_v48  ;;  %1676 = vmatmul.mubr.msk.f32.gmra.mrb[46].mxu1 %vm460_vm2, %v459_v48 }
 0x145   :  { %v2148_v56 = vpop.permute.xlu1 %894 }
 0x149   :  { %v2152_v58 = vpop.permute.xlu1 %904 }
 0x14d   :  { %v2156_v60 = vpop.permute.xlu1 %914 }
 0x151   :  { %v2160_v62 = vpop.permute.xlu1 %924 }
 0x155   :  { %v1015_v0 = vpop.permute.xlu1 %1014 }
 0x159   :  { %v2164_v2 = vpop.permute.xlu1 %1024 }
 0x15d   :  { %v2168_v21 = vpop.permute.xlu1 %1366 }
 0x1db   :  { %v575_v4 = vpop.f32.mrb[16].mxu0  ;;  %v736_v5 = vpop.f32.mrb[16].mxu1 }
 0x1dc   :  { %v927_v6 = vmul.f32 %v850_v50, %v575_v4  ;;  %v929_v8 = vmul.f32 %v850_v50, %v736_v5  ;;  %v577_v9 = vpop.f32.mrb[17].mxu0  ;;  %v738_v10 = vpop.f32.mrb[17].mxu1 }
 0x1dd   :  { %v928_v11 = vmul.f32 %v850_v50, %v577_v9  ;;  %v930_v12 = vmul.f32 %v850_v50, %v738_v10 }
 0x1de   :  { %v1087_v13 = vadd.f32 %v1010_v1, %v927_v6  ;;  %v1089_v14 = vadd.f32 %v1010_v1, %v929_v8 }
 0x1df   :  { %v1088_v15 = vadd.f32 %v1010_v1, %v928_v11  ;;  %v1090_v16 = vadd.f32 %v1010_v1, %v930_v12  ;;  %v581_v17 = vpop.f32.mrb[18].mxu0  ;;  %v742_v18 = vpop.f32.mrb[18].mxu1 }
 0x1e0   :  { %vm1151_vm3 = vcmp.gt.f32.partialorder %v1087_v13, 0.0  ;;  %v1215_v19 = vmul.f32 0.2, %v1087_v13  ;;  %vm1153_vm4 = vcmp.gt.f32.partialorder %v1089_v14, 0.0  ;;  %v1217_v20 = vmul.f32 0.2, %v1089_v14 }
 0x1e1   :  { %vm1152_vm5 = vcmp.gt.f32.partialorder %v1088_v15, 0.0  ;;  %v1216_v23 = vmul.f32 0.2, %v1088_v15  ;;  %vm1154_vm6 = vcmp.gt.f32.partialorder %v1090_v16, 0.0  ;;  %v1218_v24 = vmul.f32 0.2, %v1090_v16 }
 0x1e2   :  { %v1279_v25 = vsel %vm1151_vm3, %v1087_v13, %v1215_v19  ;;  %v1281_v26 = vsel %vm1153_vm4, %v1089_v14, %v1217_v20  ;;  %v931_v27 = vmul.f32 %v2134_v49, %v581_v17  ;;  %v933_v28 = vmul.f32 %v2134_v49, %v742_v18  ;;  %v583_v29 = vpop.f32.mrb[19].mxu0  ;;  %v744_v30 = vpop.f32.mrb[19].mxu1 }
 0x1e3   :  { %v1439_v31 = vmul.f32 %v1362_v22, %v1279_v25  ;;  %v1441_v32 = vmul.f32 %v1362_v22, %v1281_v26  ;;  %v1280_v33 = vsel %vm1152_vm5, %v1088_v15, %v1216_v23  ;;  %v1282_v34 = vsel %vm1154_vm6, %v1090_v16, %v1218_v24  ;;  %v587_v35 = vpop.f32.mrb[20].mxu0  ;;  %v748_v36 = vpop.f32.mrb[20].mxu1 }
 0x1e4   :  { %v1440_v37 = vmul.f32 %v1362_v22, %v1280_v33  ;;  %v1442_v38 = vmul.f32 %v1362_v22, %v1282_v34  ;;  %v1091_v39 = vadd.f32 %v1015_v0, %v931_v27  ;;  %v1093_v40 = vadd.f32 %v1015_v0, %v933_v28  ;;  %v589_v41 = vpop.f32.mrb[21].mxu0  ;;  %v750_v42 = vpop.f32.mrb[21].mxu1 }
 0x1e5   :  { %v932_v43 = vmul.f32 %v2134_v49, %v583_v29  ;;  %v934_v44 = vmul.f32 %v2134_v49, %v744_v30  ;;  %v935_v45 = vmul.f32 %v2138_v52, %v587_v35  ;;  %v937_v46 = vmul.f32 %v2138_v52, %v748_v36  ;;  %v1372_v16 = vpop.permute.xlu1 %1371 }
 0x1e6   :  { %vm1155_vm7 = vcmp.gt.f32.partialorder %v1091_v39, 0.0  ;;  %v1219_v47 = vmul.f32 0.2, %v1091_v39  ;;  %vm1157_vm8 = vcmp.gt.f32.partialorder %v1093_v40, 0.0  ;;  %v1221_v48 = vmul.f32 0.2, %v1093_v40 }
 0x1e7   :  { %v1092_v50 = vadd.f32 %v1015_v0, %v932_v43  ;;  %v1094_v1 = vadd.f32 %v1015_v0, %v934_v44  ;;  %v1095_v4 = vadd.f32 %v2166_v3, %v935_v45  ;;  %v1097_v5 = vadd.f32 %v2166_v3, %v937_v46  ;;  %v593_v6 = vpop.f32.mrb[22].mxu0  ;;  %v754_v8 = vpop.f32.mrb[22].mxu1 }
 0x1e8   :  { %v1283_v9 = vsel %vm1155_vm7, %v1091_v39, %v1219_v47  ;;  %v1285_v10 = vsel %vm1157_vm8, %v1093_v40, %v1221_v48  ;;  %v936_v49 = vmul.f32 %v2138_v52, %v589_v41  ;;  %v938_v11 = vmul.f32 %v2138_v52, %v750_v42  ;;  %v595_v12 = vpop.f32.mrb[23].mxu0  ;;  %v756_v13 = vpop.f32.mrb[23].mxu1 }
 0x1e9   :  { %v1443_v14 = vmul.f32 %v2168_v21, %v1283_v9  ;;  %v1445_v15 = vmul.f32 %v2168_v21, %v1285_v10  ;;  %vm1156_vm9 = vcmp.gt.f32.partialorder %v1092_v50, 0.0  ;;  %v1220_v0 = vmul.f32 0.2, %v1092_v50 }
 0x1ea   :  { %vm1158_vm10 = vcmp.gt.f32.partialorder %v1094_v1, 0.0  ;;  %v1222_v17 = vmul.f32 0.2, %v1094_v1  ;;  %vm1159_vm11 = vcmp.gt.f32.partialorder %v1095_v4, 0.0  ;;  %v1223_v18 = vmul.f32 0.2, %v1095_v4 }
 0x1eb   :  { %v1503_v19 = vadd.f32 %v1443_v14, %v1439_v31  ;;  %v1545_v20 = vadd.f32 %v1445_v15, %v1441_v32  ;;  %v1284_v22 = vsel %vm1156_vm9, %v1092_v50, %v1220_v0  ;;  %vm1161_vm12 = vcmp.gt.f32.partialorder %v1097_v5, 0.0  ;;  %v599_v23 = vpop.f32.mrb[24].mxu0  ;;  %v760_v24 = vpop.f32.mrb[24].mxu1 }
 0x1ec   :  { %v1444_v52 = vmul.f32 %v2168_v21, %v1284_v22  ;;  %v1286_v25 = vsel %vm1158_vm10, %v1094_v1, %v1222_v17  ;;  %v1287_v26 = vsel %vm1159_vm11, %v1095_v4, %v1223_v18  ;;  %v1225_v27 = vmul.f32 0.2, %v1097_v5  ;;  %v2183_v28 = vpop.f32.mrb[25].mxu0  ;;  %v762_v29 = vpop.f32.mrb[25].mxu1 }
 0x1ed   :  { %v1446_v30 = vmul.f32 %v2168_v21, %v1286_v25  ;;  %v1447_v33 = vmul.f32 %v1372_v16, %v1287_v26  ;;  %v1096_v34 = vadd.f32 %v2166_v3, %v936_v49  ;;  %v1098_v31 = vadd.f32 %v2166_v3, %v938_v11  ;;  %v2188_v32 = vpop.permute.xlu0 %1029  ;;  %v1377_v21 = vpop.permute.xlu1 %1376 }
 0x1ee   :  { %v1524_v35 = vadd.f32 %v1444_v52, %v1440_v37  ;;  %v1289_v36 = vsel %vm1161_vm12, %v1097_v5, %v1225_v27  ;;  %v939_v39 = vmul.f32 %v2136_v51, %v593_v6  ;;  %v941_v40 = vmul.f32 %v2136_v51, %v754_v8 }
 0x1ef   :  { %v1566_v41 = vadd.f32 %v1446_v30, %v1442_v38  ;;  %v1504_v42 = vadd.f32 %v1503_v19, %v1447_v33  ;;  %v1449_v43 = vmul.f32 %v1372_v16, %v1289_v36  ;;  %vm1160_vm13 = vcmp.gt.f32.partialorder %v1096_v34, 0.0  ;;  %v605_v44 = vpop.f32.mrb[26].mxu0  ;;  %v766_v45 = vpop.f32.mrb[26].mxu1 }
 0x1f0   :  { %v1224_v46 = vmul.f32 0.2, %v1096_v34  ;;  %vm1162_vm14 = vcmp.gt.f32.partialorder %v1098_v31, 0.0  ;;  %v1226_v47 = vmul.f32 0.2, %v1098_v31  ;;  %v1099_v3 = vadd.f32 %v2164_v2, %v939_v39  ;;  %v2193_v48 = vpop.f32.mrb[27].mxu0 }
 0x1f1   :  { %v1546_v37 = vadd.f32 %v1545_v20, %v1449_v43  ;;  %v1101_v50 = vadd.f32 %v2164_v2, %v941_v40  ;;  %v940_v1 = vmul.f32 %v2136_v51, %v595_v12  ;;  %v942_v38 = vmul.f32 %v2136_v51, %v756_v13  ;;  %v2198_v4 = vpop.f32.mrb[27].mxu1  ;;  %v2211_v22 = vpop.permute.xlu0 %1034 }
 0x1f2   :  { %v1288_v5 = vsel %vm1160_vm13, %v1096_v34, %v1224_v46  ;;  %v1290_v6 = vsel %vm1162_vm14, %v1098_v31, %v1226_v47  ;;  %vm1163_vm15 = vcmp.gt.f32.partialorder %v1099_v3, 0.0  ;;  %v1227_v8 = vmul.f32 0.2, %v1099_v3  ;;  %v1382_v52 = vpop.permute.xlu1 %1381 }
 0x1f3   :  { %v1448_v9 = vmul.f32 %v1372_v16, %v1288_v5  ;;  %v1450_v10 = vmul.f32 %v1372_v16, %v1290_v6  ;;  %vm1165_vm0 = vcmp.gt.f32.partialorder %v1101_v50, 0.0  ;;  %v1229_v49 = vmul.f32 0.2, %v1101_v50  ;;  %v2200_v11 = vpop.f32.mrb[28].mxu0  ;;  %v2202_v14 = vpop.f32.mrb[28].mxu1 }
 0x1f4   :  { %v1291_v15 = vsel %vm1163_vm15, %v1099_v3, %v1227_v8  ;;  %v1100_v0 = vadd.f32 %v2164_v2, %v940_v1  ;;  %v1102_v12 = vadd.f32 %v2164_v2, %v942_v38  ;;  %v943_v51 = vmul.f32 %v2142_v54, %v599_v23  ;;  %v2207_v13 = vpop.f32.mrb[29].mxu0  ;;  %v2209_v17 = vpop.f32.mrb[29].mxu1 }
 0x1f5   :  { %v1525_v18 = vadd.f32 %v1524_v35, %v1448_v9  ;;  %v1567_v19 = vadd.f32 %v1566_v41, %v1450_v10  ;;  %v1451_v16 = vmul.f32 %v1377_v21, %v1291_v15  ;;  %v1293_v20 = vsel %vm1165_vm0, %v1101_v50, %v1229_v49  ;;  %v1040_v49 = vpop.permute.xlu0 %1039 }
 0x1f6   :  { %v1453_v25 = vmul.f32 %v1377_v21, %v1293_v20  ;;  %vm1164_vm1 = vcmp.gt.f32.partialorder %v1100_v0, 0.0  ;;  %v1228_v26 = vmul.f32 0.2, %v1100_v0  ;;  %vm1166_vm2 = vcmp.gt.f32.partialorder %v1102_v12, 0.0 }
 0x1f7   :  { %v1505_v27 = vadd.f32 %v1504_v42, %v1451_v16  ;;  %v1230_v30 = vmul.f32 0.2, %v1102_v12  ;;  %v1103_v2 = vadd.f32 %v2188_v32, %v943_v51  ;;  %v945_v23 = vmul.f32 %v2142_v54, %v760_v24  ;;  %v2215_v33 = vpop.f32.mrb[30].mxu0  ;;  %v2217_v34 = vpop.f32.mrb[30].mxu1 }
 0x1f8   :  { %v1547_v31 = vadd.f32 %v1546_v37, %v1453_v25  ;;  %v1292_v35 = vsel %vm1164_vm1, %v1100_v0, %v1228_v26  ;;  %v944_v36 = vmul.f32 %v2142_v54, %v2183_v28  ;;  %v946_v39 = vmul.f32 %v2142_v54, %v762_v29  ;;  %v2222_v40 = vpop.f32.mrb[31].mxu0  ;;  %v2224_v41 = vpop.f32.mrb[31].mxu1 }
 0x1f9   :  { %v1452_v42 = vmul.f32 %v1377_v21, %v1292_v35  ;;  %v1294_v43 = vsel %vm1166_vm2, %v1102_v12, %v1230_v30  ;;  %vm1167_vm3 = vcmp.gt.f32.partialorder %v1103_v2, 0.0  ;;  %v1231_v46 = vmul.f32 0.2, %v1103_v2 }
 0x1fa   :  { %v1454_v24 = vmul.f32 %v1377_v21, %v1294_v43  ;;  %v1105_v47 = vadd.f32 %v2188_v32, %v945_v23  ;;  %v1104_v3 = vadd.f32 %v2188_v32, %v944_v36  ;;  %v1106_v37 = vadd.f32 %v2188_v32, %v946_v39 }
 0x1fb   :  { %v1526_v50 = vadd.f32 %v1525_v18, %v1452_v42  ;;  %v1295_v1 = vsel %vm1167_vm3, %v1103_v2, %v1231_v46  ;;  %v947_v28 = vmul.f32 %v2140_v53, %v605_v44  ;;  %v949_v54 = vmul.f32 %v2140_v53, %v766_v45  ;;  %v2231_v29 = vpop.f32.mrb[32].mxu0  ;;  %v2233_v38 = vpop.f32.mrb[32].mxu1 }
 0x1fc   :  { %v1568_v5 = vadd.f32 %v1567_v19, %v1454_v24  ;;  %v1455_v6 = vmul.f32 %v1382_v52, %v1295_v1  ;;  %vm1169_vm4 = vcmp.gt.f32.partialorder %v1105_v47, 0.0  ;;  %v1233_v21 = vmul.f32 0.2, %v1105_v47  ;;  %v2235_v8 = vpop.f32.mrb[33].mxu0  ;;  %v2237_v9 = vpop.f32.mrb[33].mxu1 }
 0x1fd   :  { %vm1168_vm5 = vcmp.gt.f32.partialorder %v1104_v3, 0.0  ;;  %v1232_v32 = vmul.f32 0.2, %v1104_v3  ;;  %vm1170_vm6 = vcmp.gt.f32.partialorder %v1106_v37, 0.0  ;;  %v1234_v10 = vmul.f32 0.2, %v1106_v37  ;;  %v1387_v44 = vpop.permute.xlu1 %1386 }
 0x1fe   :  { %v1506_v15 = vadd.f32 %v1505_v27, %v1455_v6  ;;  %v1297_v45 = vsel %vm1169_vm4, %v1105_v47, %v1233_v21  ;;  %v1107_v0 = vadd.f32 %v2211_v22, %v947_v28  ;;  %v1109_v12 = vadd.f32 %v2211_v22, %v949_v54 }
 0x1ff   :  { %v1457_v51 = vmul.f32 %v1382_v52, %v1297_v45  ;;  %v1296_v18 = vsel %vm1168_vm5, %v1104_v3, %v1232_v32  ;;  %v1298_v19 = vsel %vm1170_vm6, %v1106_v37, %v1234_v10  ;;  %v948_v16 = vmul.f32 %v2140_v53, %v2193_v48  ;;  %v2243_v20 = vpop.f32.mrb[34].mxu0  ;;  %v2245_v25 = vpop.f32.mrb[34].mxu1 }
 0x200   :  { %v1456_v26 = vmul.f32 %v1382_v52, %v1296_v18  ;;  %v1458_v30 = vmul.f32 %v1382_v52, %v1298_v19  ;;  %vm1171_vm7 = vcmp.gt.f32.partialorder %v1107_v0, 0.0  ;;  %v1235_v2 = vmul.f32 0.2, %v1107_v0  ;;  %v2247_v27 = vpop.f32.mrb[35].mxu0  ;;  %v2249_v23 = vpop.f32.mrb[35].mxu1 }
 0x201   :  { %v1548_v35 = vadd.f32 %v1547_v31, %v1457_v51  ;;  %vm1173_vm8 = vcmp.gt.f32.partialorder %v1109_v12, 0.0  ;;  %v1237_v36 = vmul.f32 0.2, %v1109_v12  ;;  %v1108_v39 = vadd.f32 %v2211_v22, %v948_v16  ;;  %v2271_v32 = vpop.permute.xlu0 %1044 }
 0x202   :  { %v1527_v42 = vadd.f32 %v1526_v50, %v1456_v26  ;;  %v1569_v43 = vadd.f32 %v1568_v5, %v1458_v30  ;;  %v1299_v48 = vsel %vm1171_vm7, %v1107_v0, %v1235_v2  ;;  %v950_v46 = vmul.f32 %v2140_v53, %v2198_v4 }
 0x203   :  { %v1459_v24 = vmul.f32 %v1387_v44, %v1299_v48  ;;  %v1301_v47 = vsel %vm1173_vm8, %v1109_v12, %v1237_v36  ;;  %vm1172_vm9 = vcmp.gt.f32.partialorder %v1108_v39, 0.0  ;;  %v1236_v52 = vmul.f32 0.2, %v1108_v39  ;;  %v2254_v3 = vpop.f32.mrb[36].mxu0  ;;  %v2256_v37 = vpop.f32.mrb[36].mxu1 }
 0x204   :  { %v1461_v1 = vmul.f32 %v1387_v44, %v1301_v47  ;;  %v1110_v31 = vadd.f32 %v2211_v22, %v950_v46  ;;  %v951_v28 = vmul.f32 %v2146_v55, %v2200_v11  ;;  %v953_v50 = vmul.f32 %v2146_v55, %v2202_v14  ;;  %v2263_v54 = vpop.f32.mrb[37].mxu0  ;;  %v2265_v53 = vpop.f32.mrb[37].mxu1 }
 0x205   :  { %v1507_v4 = vadd.f32 %v1506_v15, %v1459_v24  ;;  %v1300_v5 = vsel %vm1172_vm9, %v1108_v39, %v1236_v52  ;;  %v952_v6 = vmul.f32 %v2146_v55, %v2207_v13  ;;  %v954_v21 = vmul.f32 %v2146_v55, %v2209_v17  ;;  %v1392_v22 = vpop.permute.xlu1 %1391 }
 0x206   :  { %v1549_v10 = vadd.f32 %v1548_v35, %v1461_v1  ;;  %v1460_v11 = vmul.f32 %v1387_v44, %v1300_v5  ;;  %vm1174_vm10 = vcmp.gt.f32.partialorder %v1110_v31, 0.0  ;;  %v1238_v45 = vmul.f32 0.2, %v1110_v31 }
 0x207   :  { %v1111_v14 = vadd.f32 %v1040_v49, %v951_v28  ;;  %v1113_v0 = vadd.f32 %v1040_v49, %v953_v50  ;;  %v1112_v12 = vadd.f32 %v1040_v49, %v952_v6  ;;  %v1114_v51 = vadd.f32 %v1040_v49, %v954_v21  ;;  %v2273_v18 = vpop.f32.mrb[38].mxu0  ;;  %v2275_v15 = vpop.f32.mrb[38].mxu1 }
 0x208   :  { %v1528_v19 = vadd.f32 %v1527_v42, %v1460_v11  ;;  %v1302_v13 = vsel %vm1174_vm10, %v1110_v31, %v1238_v45  ;;  %v955_v55 = vmul.f32 %v2144_v7, %v2215_v33  ;;  %v957_v17 = vmul.f32 %v2144_v7, %v2217_v34  ;;  %v2281_v16 = vpop.f32.mrb[39].mxu0  ;;  %v2283_v26 = vpop.f32.mrb[39].mxu1 }
 0x209   :  { %v1462_v30 = vmul.f32 %v1387_v44, %v1302_v13  ;;  %vm1175_vm11 = vcmp.gt.f32.partialorder %v1111_v14, 0.0  ;;  %v1239_v2 = vmul.f32 0.2, %v1111_v14  ;;  %vm1177_vm12 = vcmp.gt.f32.partialorder %v1113_v0, 0.0  ;;  %v1050_v50 = vpop.permute.xlu0 %1049  ;;  %v1397_v5 = vpop.permute.xlu1 %1396 }
 0x20a   :  { %v1241_v49 = vmul.f32 0.2, %v1113_v0  ;;  %vm1176_vm13 = vcmp.gt.f32.partialorder %v1112_v12, 0.0  ;;  %v1240_v35 = vmul.f32 0.2, %v1112_v12  ;;  %vm1178_vm14 = vcmp.gt.f32.partialorder %v1114_v51, 0.0 }
 0x20b   :  { %v1570_v36 = vadd.f32 %v1569_v43, %v1462_v30  ;;  %v1303_v39 = vsel %vm1175_vm11, %v1111_v14, %v1239_v2  ;;  %v1242_v42 = vmul.f32 0.2, %v1114_v51  ;;  %v1115_v33 = vadd.f32 %v2271_v32, %v955_v55  ;;  %v2286_v48 = vpop.f32.mrb[40].mxu0  ;;  %v2288_v34 = vpop.f32.mrb[40].mxu1 }
 0x20c   :  { %v1463_v46 = vmul.f32 %v1392_v22, %v1303_v39  ;;  %v1305_v24 = vsel %vm1177_vm12, %v1113_v0, %v1241_v49  ;;  %v1304_v47 = vsel %vm1176_vm13, %v1112_v12, %v1240_v35  ;;  %v1117_v44 = vadd.f32 %v2271_v32, %v957_v17  ;;  %v2291_v52 = vpop.f32.mrb[41].mxu0  ;;  %v2293_v1 = vpop.f32.mrb[41].mxu1 }
 0x20d   :  { %v1465_v31 = vmul.f32 %v1392_v22, %v1305_v24  ;;  %v1464_v28 = vmul.f32 %v1392_v22, %v1304_v47  ;;  %v1306_v43 = vsel %vm1178_vm14, %v1114_v51, %v1242_v42  ;;  %vm1179_vm15 = vcmp.gt.f32.partialorder %v1115_v33, 0.0 }
 0x20e   :  { %v1508_v6 = vadd.f32 %v1507_v4, %v1463_v46  ;;  %v1466_v21 = vmul.f32 %v1392_v22, %v1306_v43  ;;  %v1243_v11 = vmul.f32 0.2, %v1115_v33  ;;  %vm1181_vm0 = vcmp.gt.f32.partialorder %v1117_v44, 0.0  ;;  %v1402_v43 = vpop.permute.xlu1 %1401 }
 0x20f   :  { %v1550_v45 = vadd.f32 %v1549_v10, %v1465_v31  ;;  %v1529_v14 = vadd.f32 %v1528_v19, %v1464_v28  ;;  %v1245_v0 = vmul.f32 0.2, %v1117_v44  ;;  %v956_v12 = vmul.f32 %v2144_v7, %v2222_v40  ;;  %v2297_v13 = vpop.f32.mrb[42].mxu0  ;;  %v2299_v55 = vpop.f32.mrb[42].mxu1 }
 0x210   :  { %v1571_v17 = vadd.f32 %v1570_v36, %v1466_v21  ;;  %v1307_v30 = vsel %vm1179_vm15, %v1115_v33, %v1243_v11  ;;  %v958_v51 = vmul.f32 %v2144_v7, %v2224_v41  ;;  %v959_v4 = vmul.f32 %v2150_v57, %v2231_v29  ;;  %v2305_v22 = vpop.f32.mrb[43].mxu0  ;;  %v2307_v10 = vpop.f32.mrb[43].mxu1 }
 0x211   :  { %v1467_v19 = vmul.f32 %v1397_v5, %v1307_v30  ;;  %v1309_v2 = vsel %vm1181_vm0, %v1117_v44, %v1245_v0  ;;  %v1116_v40 = vadd.f32 %v2271_v32, %v956_v12  ;;  %v961_v49 = vmul.f32 %v2150_v57, %v2233_v38  ;;  %v1055_v28 = vpop.permute.xlu0 %1054 }
 0x212   :  { %v1469_v35 = vmul.f32 %v1397_v5, %v1309_v2  ;;  %v1118_v36 = vadd.f32 %v2271_v32, %v958_v51  ;;  %v1119_v39 = vadd.f32 %v1050_v50, %v959_v4  ;;  %v960_v7 = vmul.f32 %v2150_v57, %v2235_v8 }
 0x213   :  { %v1509_v41 = vadd.f32 %v1508_v6, %v1467_v19  ;;  %vm1180_vm1 = vcmp.gt.f32.partialorder %v1116_v40, 0.0  ;;  %v1244_v29 = vmul.f32 0.2, %v1116_v40  ;;  %v1121_v42 = vadd.f32 %v1050_v50, %v961_v49  ;;  %v2315_v33 = vpop.f32.mrb[44].mxu0  ;;  %v2317_v46 = vpop.f32.mrb[44].mxu1 }
 0x214   :  { %v1551_v24 = vadd.f32 %v1550_v45, %v1469_v35  ;;  %vm1182_vm2 = vcmp.gt.f32.partialorder %v1118_v36, 0.0  ;;  %v1246_v47 = vmul.f32 0.2, %v1118_v36  ;;  %vm1183_vm3 = vcmp.gt.f32.partialorder %v1119_v39, 0.0  ;;  %v2319_v38 = vpop.f32.mrb[45].mxu0  ;;  %v2321_v44 = vpop.f32.mrb[45].mxu1 }
 0x215   :  { %v1308_v32 = vsel %vm1180_vm1, %v1116_v40, %v1244_v29  ;;  %v1247_v31 = vmul.f32 0.2, %v1119_v39  ;;  %vm1185_vm4 = vcmp.gt.f32.partialorder %v1121_v42, 0.0  ;;  %v1249_v8 = vmul.f32 0.2, %v1121_v42 }
 0x216   :  { %v1468_v6 = vmul.f32 %v1397_v5, %v1308_v32  ;;  %v1310_v21 = vsel %vm1182_vm2, %v1118_v36, %v1246_v47  ;;  %v1120_v11 = vadd.f32 %v1050_v50, %v960_v7  ;;  %v962_v0 = vmul.f32 %v2150_v57, %v2237_v9 }
 0x217   :  { %v1470_v45 = vmul.f32 %v1397_v5, %v1310_v21  ;;  %v1311_v12 = vsel %vm1183_vm3, %v1119_v39, %v1247_v31  ;;  %v1313_v30 = vsel %vm1185_vm4, %v1121_v42, %v1249_v8  ;;  %v963_v51 = vmul.f32 %v2148_v56, %v2243_v20  ;;  %v2327_v4 = vpop.f32.mrb[46].mxu0  ;;  %v2329_v19 = vpop.f32.mrb[46].mxu1 }
 0x218   :  { %v1530_v2 = vadd.f32 %v1529_v14, %v1468_v6  ;;  %v1471_v40 = vmul.f32 %v1402_v43, %v1311_v12  ;;  %v1473_v49 = vmul.f32 %v1402_v43, %v1313_v30  ;;  %vm1184_vm5 = vcmp.gt.f32.partialorder %v1120_v11, 0.0  ;;  %v2331_v35 = vpop.f32.mrb[47].mxu0  ;;  %v2333_v36 = vpop.f32.mrb[47].mxu1 }
 0x219   :  { %v1572_v7 = vadd.f32 %v1571_v17, %v1470_v45  ;;  %v1248_v57 = vmul.f32 0.2, %v1120_v11  ;;  %v1122_v9 = vadd.f32 %v1050_v50, %v962_v0  ;;  %v1123_v5 = vadd.f32 %v1055_v28, %v963_v51  ;;  %v1060_v17 = vpop.permute.xlu0 %1059 }
 0x21a   :  { %v1510_v39 = vadd.f32 %v1509_v41, %v1471_v40  ;;  %v1552_v29 = vadd.f32 %v1551_v24, %v1473_v49  ;;  %v965_v20 = vmul.f32 %v2148_v56, %v2245_v25  ;;  %v964_v42 = vmul.f32 %v2148_v56, %v2247_v27  ;;  %v1407_v27 = vpop.permute.xlu1 %1406 }
 0x21b   :  { %v1312_v14 = vsel %vm1184_vm5, %v1120_v11, %v1248_v57  ;;  %vm1186_vm6 = vcmp.gt.f32.partialorder %v1122_v9, 0.0  ;;  %v1250_v47 = vmul.f32 0.2, %v1122_v9  ;;  %vm1187_vm7 = vcmp.gt.f32.partialorder %v1123_v5, 0.0 }
 0x21c   :  { %v1472_v32 = vmul.f32 %v1402_v43, %v1312_v14  ;;  %v1251_v31 = vmul.f32 0.2, %v1123_v5  ;;  %v1125_v8 = vadd.f32 %v1055_v28, %v965_v20  ;;  %v1124_v6 = vadd.f32 %v1055_v28, %v964_v42 }
 0x21d   :  { %v1314_v21 = vsel %vm1186_vm6, %v1122_v9, %v1250_v47  ;;  %v966_v50 = vmul.f32 %v2148_v56, %v2249_v23  ;;  %v967_v41 = vmul.f32 %v2154_v59, %v2254_v3  ;;  %v969_v25 = vmul.f32 %v2154_v59, %v2256_v37 }
 0x21e   :  { %v1531_v24 = vadd.f32 %v1530_v2, %v1472_v32  ;;  %v1474_v11 = vmul.f32 %v1402_v43, %v1314_v21  ;;  %v1315_v0 = vsel %vm1187_vm7, %v1123_v5, %v1251_v31  ;;  %vm1189_vm8 = vcmp.gt.f32.partialorder %v1125_v8, 0.0  ;;  %v1065_v2 = vpop.permute.xlu0 %1064  ;;  %v1412_v32 = vpop.permute.xlu1 %1411 }
 0x21f   :  { %v1475_v45 = vmul.f32 %v1407_v27, %v1315_v0  ;;  %v1253_v12 = vmul.f32 0.2, %v1125_v8  ;;  %vm1188_vm9 = vcmp.gt.f32.partialorder %v1124_v6, 0.0  ;;  %v1252_v30 = vmul.f32 0.2, %v1124_v6 }
 0x220   :  { %v1573_v51 = vadd.f32 %v1572_v7, %v1474_v11  ;;  %v1126_v40 = vadd.f32 %v1055_v28, %v966_v50  ;;  %v1127_v49 = vadd.f32 %v1060_v17, %v967_v41  ;;  %v1129_v57 = vadd.f32 %v1060_v17, %v969_v25 }
 0x221   :  { %v1511_v56 = vadd.f32 %v1510_v39, %v1475_v45  ;;  %v1317_v23 = vsel %vm1189_vm8, %v1125_v8, %v1253_v12  ;;  %v1316_v9 = vsel %vm1188_vm9, %v1124_v6, %v1252_v30  ;;  %v968_v3 = vmul.f32 %v2154_v59, %v2263_v54 }
 0x222   :  { %v1477_v37 = vmul.f32 %v1407_v27, %v1317_v23  ;;  %v1476_v20 = vmul.f32 %v1407_v27, %v1316_v9  ;;  %vm1190_vm10 = vcmp.gt.f32.partialorder %v1126_v40, 0.0  ;;  %v1254_v43 = vmul.f32 0.2, %v1126_v40  ;;  %v1070_v12 = vpop.permute.xlu0 %1069 }
 0x223   :  { %vm1191_vm11 = vcmp.gt.f32.partialorder %v1127_v49, 0.0  ;;  %v1255_v5 = vmul.f32 0.2, %v1127_v49  ;;  %vm1193_vm12 = vcmp.gt.f32.partialorder %v1129_v57, 0.0  ;;  %v1257_v42 = vmul.f32 0.2, %v1129_v57 }
 0x224   :  { %v1553_v14 = vadd.f32 %v1552_v29, %v1477_v37  ;;  %v1532_v7 = vadd.f32 %v1531_v24, %v1476_v20  ;;  %v1318_v28 = vsel %vm1190_vm10, %v1126_v40, %v1254_v43  ;;  %v1128_v47 = vadd.f32 %v1060_v17, %v968_v3 }
 0x225   :  { %v1478_v39 = vmul.f32 %v1407_v27, %v1318_v28  ;;  %v1319_v31 = vsel %vm1191_vm11, %v1127_v49, %v1255_v5  ;;  %v1321_v8 = vsel %vm1193_vm12, %v1129_v57, %v1257_v42  ;;  %v970_v54 = vmul.f32 %v2154_v59, %v2265_v53 }
 0x226   :  { %v1479_v6 = vmul.f32 %v1412_v32, %v1319_v31  ;;  %v1481_v21 = vmul.f32 %v1412_v32, %v1321_v8  ;;  %vm1192_vm13 = vcmp.gt.f32.partialorder %v1128_v47, 0.0  ;;  %v1256_v50 = vmul.f32 0.2, %v1128_v47 }
 0x227   :  { %v1574_v41 = vadd.f32 %v1573_v51, %v1478_v39  ;;  %v1130_v25 = vadd.f32 %v1060_v17, %v970_v54  ;;  %v971_v11 = vmul.f32 %v2152_v58, %v2273_v18  ;;  %v973_v29 = vmul.f32 %v2152_v58, %v2275_v15 }
 0x228   :  { %v1512_v24 = vadd.f32 %v1511_v56, %v1479_v6  ;;  %v1554_v0 = vadd.f32 %v1553_v14, %v1481_v21  ;;  %v1320_v27 = vsel %vm1192_vm13, %v1128_v47, %v1256_v50  ;;  %v972_v45 = vmul.f32 %v2152_v58, %v2281_v16  ;;  %v1417_v56 = vpop.permute.xlu1 %1416 }
 0x229   :  { %v1480_v59 = vmul.f32 %v1412_v32, %v1320_v27  ;;  %vm1194_vm14 = vcmp.gt.f32.partialorder %v1130_v25, 0.0  ;;  %v1258_v53 = vmul.f32 0.2, %v1130_v25  ;;  %v1131_v30 = vadd.f32 %v1065_v2, %v971_v11 }
 0x22a   :  { %v1133_v40 = vadd.f32 %v1065_v2, %v973_v29  ;;  %v1132_v51 = vadd.f32 %v1065_v2, %v972_v45  ;;  %v974_v17 = vmul.f32 %v2152_v58, %v2283_v26  ;;  %v975_v18 = vmul.f32 %v2158_v61, %v2286_v48  ;;  %v1075_v26 = vpop.permute.xlu0 %1074 }
 0x22b   :  { %v1533_v15 = vadd.f32 %v1532_v7, %v1480_v59  ;;  %v1322_v49 = vsel %vm1194_vm14, %v1130_v25, %v1258_v53  ;;  %vm1195_vm15 = vcmp.gt.f32.partialorder %v1131_v30, 0.0  ;;  %v1259_v57 = vmul.f32 0.2, %v1131_v30 }
 0x22c   :  { %v1482_v23 = vmul.f32 %v1412_v32, %v1322_v49  ;;  %vm1197_vm0 = vcmp.gt.f32.partialorder %v1133_v40, 0.0  ;;  %v1261_v16 = vmul.f32 0.2, %v1133_v40  ;;  %vm1196_vm1 = vcmp.gt.f32.partialorder %v1132_v51, 0.0  ;;  %v1422_v54 = vpop.permute.xlu1 %1421 }
 0x22d   :  { %v1323_v9 = vsel %vm1195_vm15, %v1131_v30, %v1259_v57  ;;  %v1260_v3 = vmul.f32 0.2, %v1132_v51  ;;  %v1134_v37 = vadd.f32 %v1065_v2, %v974_v17  ;;  %v1135_v20 = vadd.f32 %v1070_v12, %v975_v18 }
 0x22e   :  { %v1575_v43 = vadd.f32 %v1574_v41, %v1482_v23  ;;  %v1483_v5 = vmul.f32 %v1417_v56, %v1323_v9  ;;  %v1325_v42 = vsel %vm1197_vm0, %v1133_v40, %v1261_v16  ;;  %v977_v58 = vmul.f32 %v2158_v61, %v2288_v34 }
 0x22f   :  { %v1485_v48 = vmul.f32 %v1417_v56, %v1325_v42  ;;  %v1324_v14 = vsel %vm1196_vm1, %v1132_v51, %v1260_v3  ;;  %vm1198_vm2 = vcmp.gt.f32.partialorder %v1134_v37, 0.0  ;;  %v1262_v7 = vmul.f32 0.2, %v1134_v37 }
 0x230   :  { %v1513_v28 = vadd.f32 %v1512_v24, %v1483_v5  ;;  %v1484_v47 = vmul.f32 %v1417_v56, %v1324_v14  ;;  %vm1199_vm3 = vcmp.gt.f32.partialorder %v1135_v20, 0.0  ;;  %v1263_v32 = vmul.f32 0.2, %v1135_v20  ;;  %v1427_v3 = vpop.permute.xlu1 %1426 }
 0x231   :  { %v1555_v39 = vadd.f32 %v1554_v0, %v1485_v48  ;;  %v1326_v31 = vsel %vm1198_vm2, %v1134_v37, %v1262_v7  ;;  %v1137_v8 = vadd.f32 %v1070_v12, %v977_v58  ;;  %v976_v2 = vmul.f32 %v2158_v61, %v2291_v52  ;;  %v1080_v52 = vpop.permute.xlu0 %1079 }
 0x232   :  { %v1534_v6 = vadd.f32 %v1533_v15, %v1484_v47  ;;  %v1486_v21 = vmul.f32 %v1417_v56, %v1326_v31  ;;  %v1327_v50 = vsel %vm1199_vm3, %v1135_v20, %v1263_v32  ;;  %v978_v34 = vmul.f32 %v2158_v61, %v2293_v1 }
 0x233   :  { %v1487_v41 = vmul.f32 %v1422_v54, %v1327_v50  ;;  %vm1201_vm4 = vcmp.gt.f32.partialorder %v1137_v8, 0.0  ;;  %v1265_v25 = vmul.f32 0.2, %v1137_v8  ;;  %v1136_v11 = vadd.f32 %v1070_v12, %v976_v2 }
 0x234   :  { %v1576_v29 = vadd.f32 %v1575_v43, %v1486_v21  ;;  %v1138_v24 = vadd.f32 %v1070_v12, %v978_v34  ;;  %v979_v0 = vmul.f32 %v2156_v60, %v2297_v13  ;;  %v981_v27 = vmul.f32 %v2156_v60, %v2299_v55 }
 0x235   :  { %v1514_v45 = vadd.f32 %v1513_v28, %v1487_v41  ;;  %v1329_v59 = vsel %vm1201_vm4, %v1137_v8, %v1265_v25  ;;  %vm1200_vm5 = vcmp.gt.f32.partialorder %v1136_v11, 0.0  ;;  %v1264_v53 = vmul.f32 0.2, %v1136_v11  ;;  %v1085_v37 = vpop.permute.xlu0 %1084 }
 0x236   :  { %v1489_v30 = vmul.f32 %v1422_v54, %v1329_v59  ;;  %vm1202_vm6 = vcmp.gt.f32.partialorder %v1138_v24, 0.0  ;;  %v1266_v61 = vmul.f32 0.2, %v1138_v24  ;;  %v1139_v1 = vadd.f32 %v1075_v26, %v979_v0 }
 0x237   :  { %v1328_v40 = vsel %vm1200_vm5, %v1136_v11, %v1264_v53  ;;  %v1141_v51 = vadd.f32 %v1075_v26, %v981_v27  ;;  %v980_v12 = vmul.f32 %v2156_v60, %v2305_v22  ;;  %v982_v13 = vmul.f32 %v2156_v60, %v2307_v10 }
 0x238   :  { %v1556_v17 = vadd.f32 %v1555_v39, %v1489_v30  ;;  %v1488_v18 = vmul.f32 %v1422_v54, %v1328_v40  ;;  %v1330_v55 = vsel %vm1202_vm6, %v1138_v24, %v1266_v61  ;;  %vm1203_vm7 = vcmp.gt.f32.partialorder %v1139_v1, 0.0 }
 0x239   :  { %v1490_v15 = vmul.f32 %v1422_v54, %v1330_v55  ;;  %v1267_v49 = vmul.f32 0.2, %v1139_v1  ;;  %vm1205_vm8 = vcmp.gt.f32.partialorder %v1141_v51, 0.0  ;;  %v1269_v57 = vmul.f32 0.2, %v1141_v51  ;;  %v1432_v2 = vpop.permute.xlu0 %1431 }
 0x23a   :  { %v1535_v56 = vadd.f32 %v1534_v6, %v1488_v18  ;;  %v1140_v23 = vadd.f32 %v1075_v26, %v980_v12  ;;  %v1142_v16 = vadd.f32 %v1075_v26, %v982_v13  ;;  %v983_v9 = vmul.f32 %v2162_v63, %v2315_v33 }
 0x23b   :  { %v1577_v22 = vadd.f32 %v1576_v29, %v1490_v15  ;;  %v1331_v20 = vsel %vm1203_vm7, %v1139_v1, %v1267_v49  ;;  %v1333_v43 = vsel %vm1205_vm8, %v1141_v51, %v1269_v57  ;;  %v985_v60 = vmul.f32 %v2162_v63, %v2317_v46  ;;  %v1437_v51 = vpop.permute.xlu1 %1436 }
 0x23c   :  { %v1491_v10 = vmul.f32 %v1427_v3, %v1331_v20  ;;  %v1493_v5 = vmul.f32 %v1427_v3, %v1333_v43  ;;  %vm1204_vm9 = vcmp.gt.f32.partialorder %v1140_v23, 0.0  ;;  %v1268_v42 = vmul.f32 0.2, %v1140_v23 }
 0x23d   :  { %vm1206_vm10 = vcmp.gt.f32.partialorder %v1142_v16, 0.0  ;;  %v1270_v58 = vmul.f32 0.2, %v1142_v16  ;;  %v1143_v48 = vadd.f32 %v1080_v52, %v983_v9  ;;  %v1145_v14 = vadd.f32 %v1080_v52, %v985_v60 }
 0x23e   :  { %v1515_v26 = vadd.f32 %v1514_v45, %v1491_v10  ;;  %v1557_v7 = vadd.f32 %v1556_v17, %v1493_v5  ;;  %v1332_v28 = vsel %vm1204_vm9, %v1140_v23, %v1268_v42  ;;  %v984_v33 = vmul.f32 %v2162_v63, %v2319_v38 }
 0x23f   :  { %v1492_v47 = vmul.f32 %v1427_v3, %v1332_v28  ;;  %v1334_v32 = vsel %vm1206_vm10, %v1142_v16, %v1270_v58  ;;  %vm1207_vm11 = vcmp.gt.f32.partialorder %v1143_v48, 0.0  ;;  %v1271_v39 = vmul.f32 0.2, %v1143_v48 }
 0x240   :  { %v1494_v31 = vmul.f32 %v1427_v3, %v1334_v32  ;;  %vm1209_vm12 = vcmp.gt.f32.partialorder %v1145_v14, 0.0  ;;  %v1273_v46 = vmul.f32 0.2, %v1145_v14  ;;  %v1144_v8 = vadd.f32 %v1080_v52, %v984_v33 }
 0x241   :  { %v1536_v54 = vadd.f32 %v1535_v56, %v1492_v47  ;;  %v1335_v6 = vsel %vm1207_vm11, %v1143_v48, %v1271_v39  ;;  %v986_v21 = vmul.f32 %v2162_v63, %v2321_v44  ;;  %v987_v50 = vmul.f32 %v2160_v62, %v2327_v4 }
 0x242   :  { %v1578_v34 = vadd.f32 %v1577_v22, %v1494_v31  ;;  %v1495_v41 = vmul.f32 %v1432_v2, %v1335_v6  ;;  %v1337_v38 = vsel %vm1209_vm12, %v1145_v14, %v1273_v46  ;;  %vm1208_vm13 = vcmp.gt.f32.partialorder %v1144_v8, 0.0 }
 0x243   :  { %v1497_v25 = vmul.f32 %v1432_v2, %v1337_v38  ;;  %v1272_v11 = vmul.f32 0.2, %v1144_v8  ;;  %v1146_v29 = vadd.f32 %v1080_v52, %v986_v21  ;;  %v1147_v24 = vadd.f32 %v1085_v37, %v987_v50 }
 0x244   :  { %v1516_v0 = vadd.f32 %v1515_v26, %v1495_v41  ;;  %v989_v27 = vmul.f32 %v2160_v62, %v2329_v19  ;;  %v988_v45 = vmul.f32 %v2160_v62, %v2331_v35  ;;  %v990_v63 = vmul.f32 %v2160_v62, %v2333_v36 }
 0x245   :  { %v1558_v44 = vadd.f32 %v1557_v7, %v1497_v25  ;;  %v1336_v4 = vsel %vm1208_vm13, %v1144_v8, %v1272_v11  ;;  %vm1210_vm14 = vcmp.gt.f32.partialorder %v1146_v29, 0.0  ;;  %v1274_v59 = vmul.f32 0.2, %v1146_v29 }
 0x246   :  { %v1496_v53 = vmul.f32 %v1432_v2, %v1336_v4  ;;  %vm1211_vm15 = vcmp.gt.f32.partialorder %v1147_v24, 0.0  ;;  %v1275_v30 = vmul.f32 0.2, %v1147_v24  ;;  %v1149_v61 = vadd.f32 %v1085_v37, %v989_v27 }
 0x247   :  { %v1338_v52 = vsel %vm1210_vm14, %v1146_v29, %v1274_v59  ;;  %v1148_v1 = vadd.f32 %v1085_v37, %v988_v45  ;;  %v1150_v40 = vadd.f32 %v1085_v37, %v990_v63  ;;  %v1718_v48 = vmov 1966171168  }
 0x248   :  { %v1537_v12 = vadd.f32 %v1536_v54, %v1496_v53  ;;  %v1498_v19 = vmul.f32 %v1432_v2, %v1338_v52  ;;  %v1339_v13 = vsel %vm1211_vm15, %v1147_v24, %v1275_v30  ;;  %vm1213_vm0 = vcmp.gt.f32.partialorder %v1149_v61, 0.0 }
 0x249   :  { %v1499_v35 = vmul.f32 %v1437_v51, %v1339_v13  ;;  %v1277_v17 = vmul.f32 0.2, %v1149_v61  ;;  %vm1212_vm1 = vcmp.gt.f32.partialorder %v1148_v1, 0.0  ;;  %v1276_v62 = vmul.f32 0.2, %v1148_v1 }
 0x24a   :  { %v1579_v36 = vadd.f32 %v1578_v34, %v1498_v19  ;;  %vm1214_vm2 = vcmp.gt.f32.partialorder %v1150_v40, 0.0  ;;  %v1278_v18 = vmul.f32 0.2, %v1150_v40  ;;  %v1594_v14 = vunpack.c.l.s4 %v1718_v48 }
 0x24b   :  { %v1517_v55 = vadd.f32 %v1516_v0, %v1499_v35  ;;  %v1341_v15 = vsel %vm1213_vm0, %v1149_v61, %v1277_v17  ;;  %v1340_v49 = vsel %vm1212_vm1, %v1148_v1, %v1276_v62  ;;  %v1596_v26 = vlaneseq }
 0x24c   :  { %v1501_v57 = vmul.f32 %v1437_v51, %v1341_v15  ;;  %v1500_v56 = vmul.f32 %v1437_v51, %v1340_v49  ;;  %v1342_v23 = vsel %vm1214_vm2, %v1150_v40, %v1278_v18  ;;  %v1595_v8 = vunpack.c.0.s8 %v1594_v14 }
 0x24d   :  { %v1518_v16 = vrot.slane %v1517_v55, 4  ;;  %v1502_v9 = vmul.f32 %v1437_v51, %v1342_v23  ;;  %v1597_v2 = vshrl.u32 %v1596_v26, 7  ;;  %vm1618_vm3 = vcmp.lt.s32.totalorder %v1596_v26, 512 }
 0x24e   :  { %v1559_v3 = vadd.f32 %v1558_v44, %v1501_v57  ;;  %v1538_v37 = vadd.f32 %v1537_v12, %v1500_v56 }
 0x24f   :  { %v1519_v22 = vadd.f32 %v1518_v16, %v1517_v55  ;;  %v1580_v20 = vadd.f32 %v1579_v36, %v1502_v9  ;;  %v1598_v25 = vsub.s32 %v1595_v8, %v1597_v2 }
 0x250   :  { %v1560_v43 = vrot.slane %v1559_v3, 4  ;;  %v1539_v60 = vrot.slane %v1538_v37, 4 }
 0x251   :  { %v1520_v10 = vrot.slane %v1519_v22, 2  ;;  %v1581_v5 = vrot.slane %v1580_v20, 4 }
 0x252   :  { %v1561_v42 = vadd.f32 %v1560_v43, %v1559_v3  ;;  %v1540_v58 = vadd.f32 %v1539_v60, %v1538_v37 }
 0x253   :  { %v1521_v7 = vadd.f32 %v1520_v10, %v1519_v22  ;;  %v1582_v28 = vadd.f32 %v1581_v5, %v1580_v20 }
 0x254   :  { %v1562_v33 = vrot.slane %v1561_v42, 2  ;;  %v1541_v47 = vrot.slane %v1540_v58, 2 }
 0x255   :  { %v1522_v32 = vrot.slane %v1521_v7, 1  ;;  %v1583_v39 = vrot.slane %v1582_v28, 2 }
 0x256   :  { %v1563_v31 = vadd.f32 %v1562_v33, %v1561_v42  ;;  %v1542_v46 = vadd.f32 %v1541_v47, %v1540_v58 }
 0x257   :  { %v1584_v54 = vadd.f32 %v1583_v39, %v1582_v28  ;;  %v1523_v6 = vadd.f32 %v1522_v32, %v1521_v7 }
 0x258   :  { %v1564_v21 = vrot.slane %v1563_v31, 1  ;;  %v1543_v50 = vrot.slane %v1542_v46, 1 }
 0x259   :  { %v1585_v34 = vrot.slane %v1584_v54, 1 }
 0x25a   :  { %v1565_v41 = vadd.f32 %v1564_v21, %v1563_v31  ;;  %v1544_v38 = vadd.f32 %v1543_v50, %v1542_v46 }
 0x25b   :  { %v1586_v11 = vadd.f32 %v1585_v34, %v1584_v54 }
 0x25c   :  { %v1591_v29 = vcombine.low %v1523_v6, %v1544_v38 }
 0x25d   :  { %v1592_v24 = vcombine.low %v1565_v41, %v1586_v11 }
 0x25e   :  { %v1599_v0 = vrot.slane %v1591_v29, %v1598_v25 }
 0x25f   :  { %v1606_v27 = vrot.slane %v1592_v24, %v1598_v25 }
 0x261   :  { %v1607_v45 = vcombine.low %v1599_v0, %v1606_v27 }
 0x263   :  { %v1614_v63 = vrot.slane %v1607_v45, %v1598_v25 }
 0x265   :  { %1620 = vst.msk [vmem:[%s2399_s7] sm:$0xf] %vm1618_vm3, %v1614_v63 }

</bundles_post_ra>
